<compile_context>
chip_gen: v6e
topology: v6e:2x2x1
jax: 0.10.0
libtpu: 0.0.40
codegen_flags: <defaults>
</compile_context>

<pallas_src>
import functools

import jax
import jax.numpy as jnp
import numpy as np
from jax.experimental import pallas as pl
from jax.experimental.pallas import tpu as pltpu


def _query_and_group_kernel(xyz_nd_ref, ctr_dt_ref, src_ref, out_ref, *,
                            radius, nsample, use_xyz, normalize_xyz,
                            slot_chunk, dot_dtype, gather_precision):
    """One (batch, query-tile) grid step.

    Block shapes (leading batch dim = 1):
      xyz_nd_ref : (1, N, 3)       points (distance math, reference op order)
      ctr_dt_ref : (1, 3, TQ)      query centers, transposed (lane-dense)
      src_ref    : (1, c_out, N)   gather source = [xyz^T ; features] (or just
                                   features when use_xyz=False), host-concatenated
      out_ref    : (1, nsample, c_out, TQ)  s-major output block
    """
    xyz_nd = xyz_nd_ref[0].astype(jnp.float32)   # (N, 3)
    ctr_dt = ctr_dt_ref[0].astype(jnp.float32)   # (3, TQ)
    src = src_ref[0]                             # (c_out, N), already dot_dtype

    n = xyz_nd.shape[0]
    tq = ctr_dt.shape[1]
    c_out = src.shape[0]
    r2 = jnp.float32(float(radius) * float(radius))

    # ---------------- ball query ----------------
    # (x - c)^2 with the same op order as the CUDA/numpy reference so the strict
    # `< r^2` membership test never flips near the boundary.
    dist2 = jnp.zeros((n, tq), jnp.float32)
    for d in range(3):
        diff = xyz_nd[:, d:d + 1] - ctr_dt[d:d + 1, :]
        dist2 = dist2 + diff * diff
    inball_f = (dist2 < r2).astype(jnp.float32)            # (N, TQ) exact 0/1

    # Inclusive prefix count of hits along N via a Hillis-Steele doubling scan.
    # O(N*TQ*logN) VPU work, no (N, N) temporaries.
    cnt = inball_f
    k = 1
    while k < n:
        shifted = jnp.concatenate(
            [jnp.zeros((k, tq), jnp.float32), cnt[:n - k, :]], axis=0)
        cnt = cnt + shifted
        k *= 2

    total = cnt[n - 1:n, :]                                # (1, TQ) hits / query

    # Fallback one-hot: first in-ball point; point 0 if the ball is empty
    # (matches CUDA ball_query, which leaves idx at its zero init).
    row_iota = jax.lax.broadcasted_iota(jnp.int32, (n, tq), 0)
    onehot_row0 = (row_iota == 0).astype(jnp.float32)
    hit_first = jnp.where(cnt == 1.0, inball_f, 0.0)
    fallback = jnp.where(total >= 1.0, hit_first, onehot_row0)

    # Hoisted per-tile adjustment operands (center subtract / radius scale).
    if use_xyz:
        c_feat = c_out - 3
        sub_full = jnp.concatenate(
            [ctr_dt, jnp.zeros((c_feat, tq), jnp.float32)], axis=0)   # (c_out, TQ)
        if normalize_xyz:
            scale_col = jnp.concatenate(
                [jnp.full((3, 1), 1.0 / float(radius), jnp.float32),
                 jnp.ones((c_feat, 1), jnp.float32)], axis=0)         # (c_out, 1)

    # ---------------- grouping: one-hot gather on the MXU ----------------
    # Hit masks ARE the one-hots; slots are batched into one
    # (c_out, N) x (N, S*TQ) matmul per chunk.
    for s0 in range(0, nsample, slot_chunk):
        slots = list(range(s0, min(s0 + slot_chunk, nsample)))
        onehots = []
        for s in slots:
            sf = jnp.float32(s + 1)
            hit_s = jnp.where(cnt == sf, inball_f, 0.0)     # (s+1)-th in-ball point
            onehots.append(jnp.where(total >= sf, hit_s, fallback))
        onehot_chunk = jnp.concatenate(onehots, axis=1)     # (N, S*TQ)
        if onehot_chunk.dtype != dot_dtype:
            onehot_chunk = onehot_chunk.astype(dot_dtype)

        res = jnp.dot(src, onehot_chunk,
                      preferred_element_type=jnp.float32,
                      precision=gather_precision)           # (c_out, S*TQ) f32

        for j, s in enumerate(slots):
            res_s = res[:, j * tq:(j + 1) * tq]             # (c_out, TQ)
            if use_xyz:
                res_s = res_s - sub_full                    # center-subtract xyz rows
                if normalize_xyz:
                    res_s = res_s * scale_col
            # Full lane-dense (c_out, TQ) slab store per slot.
            out_ref[0, s, :, :] = res_s.astype(out_ref.dtype)


def query_and_group(xyz, new_xyz, features, *, radius, nsample, use_xyz=True,
                    normalize_xyz=False, ret_grouped_xyz=False):
    """Pallas equivalent of QueryAndGroup.forward (features required)."""
    B, N, three = xyz.shape
    assert three == 3
    _, npoint, _ = new_xyz.shape
    assert features is not None  # TODO(synk): features=None (xyz-only) path.
    _, C, Nf = features.shape
    assert Nf == N
    out_dtype = features.dtype

    # Gather matmul operand dtype: bf16 features stay bf16 (1 MXU pass); f32
    # features need Precision.HIGHEST so the one-hot gather is exact.
    if features.dtype == jnp.bfloat16:
        dot_dtype = jnp.bfloat16
        gather_precision = jax.lax.Precision.DEFAULT
    else:
        dot_dtype = jnp.float32
        gather_precision = jax.lax.Precision.HIGHEST

    # Lane-dense layouts + single host-side concat of the gather source.
    xyz_dn = jnp.transpose(xyz, (0, 2, 1))        # (B, 3, N)
    ctr_dt = jnp.transpose(new_xyz, (0, 2, 1))    # (B, 3, npoint)
    if use_xyz:
        src = jnp.concatenate([xyz_dn.astype(dot_dtype),
                               features.astype(dot_dtype)], axis=1)   # (B, 3+C, N)
    else:
        src = features.astype(dot_dtype)                              # (B, C, N)
    c_out = src.shape[1]

    # Query tile: full npoint when small; otherwise a 128-multiple divisor,
    # capped at 256 so the working set fits v7x's 64 MiB VMEM.
    if npoint <= 256:
        tq = npoint
    else:
        tq = next((t for t in (256, 128) if npoint % t == 0), npoint)
        # TODO(synk): pad npoint when it has no 128-multiple divisor instead of
        #             falling back to one huge query tile.
    if B * (npoint // tq) < 2 and tq % 256 == 0:
        tq //= 2   # give the second TensorCore (v7x) a grid step

    # Slot chunk: cap the batched one-hot operand at ~4 MiB of VMEM.
    onehot_budget = 4 * 1024 * 1024
    slot_chunk = max(1, min(int(nsample),
                            onehot_budget // (N * tq * jnp.dtype(dot_dtype).itemsize)))

    grid = (B, npoint // tq)
    kernel = functools.partial(
        _query_and_group_kernel, radius=float(radius), nsample=int(nsample),
        use_xyz=bool(use_xyz), normalize_xyz=bool(normalize_xyz),
        slot_chunk=int(slot_chunk), dot_dtype=dot_dtype,
        gather_precision=gather_precision)

    compiler_params = None
    if jax.default_backend() == "tpu":
        compiler_params = pltpu.CompilerParams(
            dimension_semantics=("parallel", "parallel"),
            vmem_limit_bytes=48 * 1024 * 1024)

    out = pl.pallas_call(
        kernel,
        out_shape=jax.ShapeDtypeStruct((B, nsample, c_out, npoint), out_dtype),
        grid_spec=pltpu.PrefetchScalarGridSpec(
            num_scalar_prefetch=0,
            grid=grid,
            in_specs=[
                pl.BlockSpec((1, N, 3), lambda b, q: (b, 0, 0)),       # xyz (dist)
                pl.BlockSpec((1, 3, tq), lambda b, q: (b, 0, q)),      # new_xyz^T tile
                pl.BlockSpec((1, c_out, N), lambda b, q: (b, 0, 0)),   # gather source
            ],
            out_specs=pl.BlockSpec((1, nsample, c_out, tq),
                                   lambda b, q: (b, 0, 0, q)),
        ),
        compiler_params=compiler_params,
    )(xyz, ctr_dt, src)

    # (B, nsample, c_out, npoint) -> (B, c_out, npoint, nsample).  Kept in the
    # wrapper: nsample < 128 would make in-kernel stores lane-sparse; skip it if
    # the consumer can take the s-major layout directly.
    new_features = jnp.transpose(out, (0, 2, 3, 1))
    if ret_grouped_xyz:
        assert use_xyz  # TODO(synk): ret_grouped_xyz with use_xyz=False.
        return new_features, new_features[:, :3]
    return new_features


def _reference_query_and_group(xyz, new_xyz, features, radius, nsample,
                               use_xyz=True, normalize_xyz=False):
    """Pure numpy port of the CUDA ball_query + group_points reference."""
    xyz = np.asarray(xyz, np.float32)
    new_xyz = np.asarray(new_xyz, np.float32)
    feats = np.asarray(features, np.float32)
    B, N, _ = xyz.shape
    npoint = new_xyz.shape[1]

    r2 = np.float32(radius * radius)
    d2 = ((xyz[:, None, :, :] - new_xyz[:, :, None, :]) ** 2).sum(-1)    # (B, npoint, N)
    mask = d2 < r2

    idx = np.zeros((B, npoint, nsample), dtype=np.int64)
    for b in range(B):
        for j in range(npoint):
            cnt = 0
            for k in range(N):
                if mask[b, j, k]:
                    if cnt == 0:
                        idx[b, j, :] = k
                    idx[b, j, cnt] = k
                    cnt += 1
                    if cnt >= nsample:
                        break

    grouped_xyz = np.stack([xyz[b][idx[b]] for b in range(B)])           # (B, npoint, nsample, 3)
    grouped_xyz = grouped_xyz - new_xyz[:, :, None, :]
    grouped_xyz = grouped_xyz.transpose(0, 3, 1, 2)                      # (B, 3, npoint, nsample)
    if normalize_xyz:
        grouped_xyz = grouped_xyz / np.float32(radius)
    grouped_feat = np.stack([feats[b][:, idx[b]] for b in range(B)])     # (B, C, npoint, nsample)
    if use_xyz:
        return np.concatenate([grouped_xyz, grouped_feat], axis=1)
    return grouped_feat


if __name__ == "__main__":
    key = jax.random.PRNGKey(0)
    k_xyz, k_feat = jax.random.split(key)

    B, N, npoint, nsample, C = 2, 64, 16, 8, 4
    radius = 0.3

    xyz = jax.random.uniform(k_xyz, (B, N, 3), dtype=jnp.float32)
    new_xyz = xyz[:, :npoint, :]                 # centroids = subset of the points
    features = jax.random.normal(k_feat, (B, C, N), dtype=jnp.float32)

    out = query_and_group(xyz, new_xyz, features, radius=radius, nsample=nsample,
                          use_xyz=True, normalize_xyz=False)
    out = jax.block_until_ready(out)

    assert out.shape == (B, 3 + C, npoint, nsample)
    assert out.dtype == features.dtype

    ref = _reference_query_and_group(xyz, new_xyz, features, radius, nsample,
                                     use_xyz=True, normalize_xyz=False)
    np.testing.assert_allclose(np.asarray(out), ref, rtol=1e-4, atol=1e-4)

    print("KERNEL_OK")
</pallas_src>

<mosaic_0001>
module attributes {stable_mosaic.version = 11 : i64} {
  func.func @_query_and_group_kernel(%arg0: i32, %arg1: i32, %arg2: memref<1x64x3xf32, #tpu.memory_space<vmem>>, %arg3: memref<1x3x16xf32, #tpu.memory_space<vmem>>, %arg4: memref<1x7x64xf32, #tpu.memory_space<vmem>>, %arg5: memref<1x8x7x16xf32, #tpu.memory_space<vmem>>) attributes {dimension_semantics = [#tpu.dimension_semantics<arbitrary>, #tpu.dimension_semantics<arbitrary>], iteration_bounds = array<i64: 2, 1>, scalar_prefetch = 0 : i64, scratch_operands = 0 : i64, tpu.core_type = #tpu.core_type<tc>, window_params = [{transform_indices = @transform_0, window_bounds = array<i64: 1, 64, 3>}, {transform_indices = @transform_1, window_bounds = array<i64: 1, 3, 16>}, {transform_indices = @transform_2, window_bounds = array<i64: 1, 7, 64>}, {transform_indices = @transform_3, window_bounds = array<i64: 1, 8, 7, 16>}]} {
    %c0 = arith.constant 0 : index
    %c0_0 = arith.constant 0 : index
    %c0_1 = arith.constant 0 : index
    %0 = vector.load %arg2[%c0, %c0_0, %c0_1] : memref<1x64x3xf32, #tpu.memory_space<vmem>>, vector<1x64x3xf32>
    %1 = vector.shape_cast %0 : vector<1x64x3xf32> to vector<64x3xf32>
    %c0_2 = arith.constant 0 : index
    %c0_3 = arith.constant 0 : index
    %c0_4 = arith.constant 0 : index
    %2 = vector.load %arg3[%c0_2, %c0_3, %c0_4] : memref<1x3x16xf32, #tpu.memory_space<vmem>>, vector<1x3x16xf32>
    %3 = vector.shape_cast %2 : vector<1x3x16xf32> to vector<3x16xf32>
    %c0_5 = arith.constant 0 : index
    %c0_6 = arith.constant 0 : index
    %c0_7 = arith.constant 0 : index
    %4 = vector.load %arg4[%c0_5, %c0_6, %c0_7] : memref<1x7x64xf32, #tpu.memory_space<vmem>>, vector<1x7x64xf32>
    %5 = vector.shape_cast %4 : vector<1x7x64xf32> to vector<7x64xf32>
    %cst = arith.constant 0.000000e+00 : f32
    %6 = vector.broadcast %cst : f32 to vector<64x16xf32>
    %7 = vector.extract_strided_slice %1 {offsets = [0, 0], sizes = [64, 1], strides = [1, 1]} : vector<64x3xf32> to vector<64x1xf32>
    %8 = vector.extract_strided_slice %3 {offsets = [0, 0], sizes = [1, 16], strides = [1, 1]} : vector<3x16xf32> to vector<1x16xf32>
    %9 = vector.broadcast %7 : vector<64x1xf32> to vector<64x16xf32>
    %10 = vector.broadcast %8 : vector<1x16xf32> to vector<64x16xf32>
    %11 = arith.subf %9, %10 : vector<64x16xf32>
    %12 = arith.mulf %11, %11 : vector<64x16xf32>
    %13 = arith.addf %6, %12 : vector<64x16xf32>
    %14 = vector.extract_strided_slice %1 {offsets = [0, 1], sizes = [64, 1], strides = [1, 1]} : vector<64x3xf32> to vector<64x1xf32>
    %15 = vector.extract_strided_slice %3 {offsets = [1, 0], sizes = [1, 16], strides = [1, 1]} : vector<3x16xf32> to vector<1x16xf32>
    %16 = vector.broadcast %14 : vector<64x1xf32> to vector<64x16xf32>
    %17 = vector.broadcast %15 : vector<1x16xf32> to vector<64x16xf32>
    %18 = arith.subf %16, %17 : vector<64x16xf32>
    %19 = arith.mulf %18, %18 : vector<64x16xf32>
    %20 = arith.addf %13, %19 : vector<64x16xf32>
    %21 = vector.extract_strided_slice %1 {offsets = [0, 2], sizes = [64, 1], strides = [1, 1]} : vector<64x3xf32> to vector<64x1xf32>
    %22 = vector.extract_strided_slice %3 {offsets = [2, 0], sizes = [1, 16], strides = [1, 1]} : vector<3x16xf32> to vector<1x16xf32>
    %23 = vector.broadcast %21 : vector<64x1xf32> to vector<64x16xf32>
    %24 = vector.broadcast %22 : vector<1x16xf32> to vector<64x16xf32>
    %25 = arith.subf %23, %24 : vector<64x16xf32>
    %26 = arith.mulf %25, %25 : vector<64x16xf32>
    %27 = arith.addf %20, %26 : vector<64x16xf32>
    %cst_8 = arith.constant 9.000000e-02 : f32
    %28 = vector.broadcast %cst_8 : f32 to vector<64x16xf32>
    %29 = arith.cmpf olt, %27, %28 : vector<64x16xf32>
    %30 = arith.extui %29 : vector<64x16xi1> to vector<64x16xi32>
    %31 = arith.sitofp %30 : vector<64x16xi32> to vector<64x16xf32>
    %cst_9 = arith.constant 0.000000e+00 : f32
    %32 = vector.broadcast %cst_9 : f32 to vector<1x16xf32>
    %33 = vector.extract_strided_slice %31 {offsets = [0, 0], sizes = [63, 16], strides = [1, 1]} : vector<64x16xf32> to vector<63x16xf32>
    %34 = tpu.concatenate %32, %33 in 0 : vector<1x16xf32>, vector<63x16xf32> -> vector<64x16xf32>
    %35 = arith.addf %31, %34 : vector<64x16xf32>
    %cst_10 = arith.constant 0.000000e+00 : f32
    %36 = vector.broadcast %cst_10 : f32 to vector<2x16xf32>
    %37 = vector.extract_strided_slice %35 {offsets = [0, 0], sizes = [62, 16], strides = [1, 1]} : vector<64x16xf32> to vector<62x16xf32>
    %38 = tpu.concatenate %36, %37 in 0 : vector<2x16xf32>, vector<62x16xf32> -> vector<64x16xf32>
    %39 = arith.addf %35, %38 : vector<64x16xf32>
    %cst_11 = arith.constant 0.000000e+00 : f32
    %40 = vector.broadcast %cst_11 : f32 to vector<4x16xf32>
    %41 = vector.extract_strided_slice %39 {offsets = [0, 0], sizes = [60, 16], strides = [1, 1]} : vector<64x16xf32> to vector<60x16xf32>
    %42 = tpu.concatenate %40, %41 in 0 : vector<4x16xf32>, vector<60x16xf32> -> vector<64x16xf32>
    %43 = arith.addf %39, %42 : vector<64x16xf32>
    %cst_12 = arith.constant 0.000000e+00 : f32
    %44 = vector.broadcast %cst_12 : f32 to vector<8x16xf32>
    %45 = vector.extract_strided_slice %43 {offsets = [0, 0], sizes = [56, 16], strides = [1, 1]} : vector<64x16xf32> to vector<56x16xf32>
    %46 = tpu.concatenate %44, %45 in 0 : vector<8x16xf32>, vector<56x16xf32> -> vector<64x16xf32>
    %47 = arith.addf %43, %46 : vector<64x16xf32>
    %cst_13 = arith.constant 0.000000e+00 : f32
    %48 = vector.broadcast %cst_13 : f32 to vector<16x16xf32>
    %49 = vector.extract_strided_slice %47 {offsets = [0, 0], sizes = [48, 16], strides = [1, 1]} : vector<64x16xf32> to vector<48x16xf32>
    %50 = tpu.concatenate %48, %49 in 0 : vector<16x16xf32>, vector<48x16xf32> -> vector<64x16xf32>
    %51 = arith.addf %47, %50 : vector<64x16xf32>
    %cst_14 = arith.constant 0.000000e+00 : f32
    %52 = vector.broadcast %cst_14 : f32 to vector<32x16xf32>
    %53 = vector.extract_strided_slice %51 {offsets = [0, 0], sizes = [32, 16], strides = [1, 1]} : vector<64x16xf32> to vector<32x16xf32>
    %54 = tpu.concatenate %52, %53 in 0 : vector<32x16xf32>, vector<32x16xf32> -> vector<64x16xf32>
    %55 = arith.addf %51, %54 : vector<64x16xf32>
    %56 = vector.extract_strided_slice %55 {offsets = [63, 0], sizes = [1, 16], strides = [1, 1]} : vector<64x16xf32> to vector<1x16xf32>
    %57 = tpu.iota {dimensions = array<i32: 0>} : vector<64x16xi32>
    %c0_i32 = arith.constant 0 : i32
    %58 = vector.broadcast %c0_i32 : i32 to vector<64x16xi32>
    %59 = arith.cmpi eq, %57, %58 : vector<64x16xi32>
    %60 = arith.extui %59 : vector<64x16xi1> to vector<64x16xi32>
    %61 = arith.sitofp %60 : vector<64x16xi32> to vector<64x16xf32>
    %cst_15 = arith.constant 1.000000e+00 : f32
    %62 = vector.broadcast %cst_15 : f32 to vector<64x16xf32>
    %63 = arith.cmpf oeq, %55, %62 : vector<64x16xf32>
    %cst_16 = arith.constant 0.000000e+00 : f32
    %64 = vector.broadcast %cst_16 : f32 to vector<64x16xf32>
    %65 = arith.select %63, %31, %64 : vector<64x16xi1>, vector<64x16xf32>
    %cst_17 = arith.constant 1.000000e+00 : f32
    %66 = vector.broadcast %cst_17 : f32 to vector<1x16xf32>
    %67 = arith.cmpf oge, %56, %66 : vector<1x16xf32>
    %68 = vector.shape_cast %67 : vector<1x16xi1> to vector<1x16xi1>
    %69 = vector.broadcast %68 : vector<1x16xi1> to vector<64x16xi1>
    %70 = arith.select %69, %65, %61 : vector<64x16xi1>, vector<64x16xf32>
    %cst_18 = arith.constant 0.000000e+00 : f32
    %71 = vector.broadcast %cst_18 : f32 to vector<4x16xf32>
    %72 = tpu.concatenate %3, %71 in 0 : vector<3x16xf32>, vector<4x16xf32> -> vector<7x16xf32>
    %cst_19 = arith.constant 1.000000e+00 : f32
    %73 = vector.broadcast %cst_19 : f32 to vector<64x16xf32>
    %74 = arith.cmpf oeq, %55, %73 : vector<64x16xf32>
    %cst_20 = arith.constant 0.000000e+00 : f32
    %75 = vector.broadcast %cst_20 : f32 to vector<64x16xf32>
    %76 = arith.select %74, %31, %75 : vector<64x16xi1>, vector<64x16xf32>
    %cst_21 = arith.constant 1.000000e+00 : f32
    %77 = vector.broadcast %cst_21 : f32 to vector<1x16xf32>
    %78 = arith.cmpf oge, %56, %77 : vector<1x16xf32>
    %79 = vector.shape_cast %78 : vector<1x16xi1> to vector<1x16xi1>
    %80 = vector.broadcast %79 : vector<1x16xi1> to vector<64x16xi1>
    %81 = arith.select %80, %76, %70 : vector<64x16xi1>, vector<64x16xf32>
    %cst_22 = arith.constant 2.000000e+00 : f32
    %82 = vector.broadcast %cst_22 : f32 to vector<64x16xf32>
    %83 = arith.cmpf oeq, %55, %82 : vector<64x16xf32>
    %cst_23 = arith.constant 0.000000e+00 : f32
    %84 = vector.broadcast %cst_23 : f32 to vector<64x16xf32>
    %85 = arith.select %83, %31, %84 : vector<64x16xi1>, vector<64x16xf32>
    %cst_24 = arith.constant 2.000000e+00 : f32
    %86 = vector.broadcast %cst_24 : f32 to vector<1x16xf32>
    %87 = arith.cmpf oge, %56, %86 : vector<1x16xf32>
    %88 = vector.shape_cast %87 : vector<1x16xi1> to vector<1x16xi1>
    %89 = vector.broadcast %88 : vector<1x16xi1> to vector<64x16xi1>
    %90 = arith.select %89, %85, %70 : vector<64x16xi1>, vector<64x16xf32>
    %cst_25 = arith.constant 3.000000e+00 : f32
    %91 = vector.broadcast %cst_25 : f32 to vector<64x16xf32>
    %92 = arith.cmpf oeq, %55, %91 : vector<64x16xf32>
    %cst_26 = arith.constant 0.000000e+00 : f32
    %93 = vector.broadcast %cst_26 : f32 to vector<64x16xf32>
    %94 = arith.select %92, %31, %93 : vector<64x16xi1>, vector<64x16xf32>
    %cst_27 = arith.constant 3.000000e+00 : f32
    %95 = vector.broadcast %cst_27 : f32 to vector<1x16xf32>
    %96 = arith.cmpf oge, %56, %95 : vector<1x16xf32>
    %97 = vector.shape_cast %96 : vector<1x16xi1> to vector<1x16xi1>
    %98 = vector.broadcast %97 : vector<1x16xi1> to vector<64x16xi1>
    %99 = arith.select %98, %94, %70 : vector<64x16xi1>, vector<64x16xf32>
    %cst_28 = arith.constant 4.000000e+00 : f32
    %100 = vector.broadcast %cst_28 : f32 to vector<64x16xf32>
    %101 = arith.cmpf oeq, %55, %100 : vector<64x16xf32>
    %cst_29 = arith.constant 0.000000e+00 : f32
    %102 = vector.broadcast %cst_29 : f32 to vector<64x16xf32>
    %103 = arith.select %101, %31, %102 : vector<64x16xi1>, vector<64x16xf32>
    %cst_30 = arith.constant 4.000000e+00 : f32
    %104 = vector.broadcast %cst_30 : f32 to vector<1x16xf32>
    %105 = arith.cmpf oge, %56, %104 : vector<1x16xf32>
    %106 = vector.shape_cast %105 : vector<1x16xi1> to vector<1x16xi1>
    %107 = vector.broadcast %106 : vector<1x16xi1> to vector<64x16xi1>
    %108 = arith.select %107, %103, %70 : vector<64x16xi1>, vector<64x16xf32>
    %cst_31 = arith.constant 5.000000e+00 : f32
    %109 = vector.broadcast %cst_31 : f32 to vector<64x16xf32>
    %110 = arith.cmpf oeq, %55, %109 : vector<64x16xf32>
    %cst_32 = arith.constant 0.000000e+00 : f32
    %111 = vector.broadcast %cst_32 : f32 to vector<64x16xf32>
    %112 = arith.select %110, %31, %111 : vector<64x16xi1>, vector<64x16xf32>
    %cst_33 = arith.constant 5.000000e+00 : f32
    %113 = vector.broadcast %cst_33 : f32 to vector<1x16xf32>
    %114 = arith.cmpf oge, %56, %113 : vector<1x16xf32>
    %115 = vector.shape_cast %114 : vector<1x16xi1> to vector<1x16xi1>
    %116 = vector.broadcast %115 : vector<1x16xi1> to vector<64x16xi1>
    %117 = arith.select %116, %112, %70 : vector<64x16xi1>, vector<64x16xf32>
    %cst_34 = arith.constant 6.000000e+00 : f32
    %118 = vector.broadcast %cst_34 : f32 to vector<64x16xf32>
    %119 = arith.cmpf oeq, %55, %118 : vector<64x16xf32>
    %cst_35 = arith.constant 0.000000e+00 : f32
    %120 = vector.broadcast %cst_35 : f32 to vector<64x16xf32>
    %121 = arith.select %119, %31, %120 : vector<64x16xi1>, vector<64x16xf32>
    %cst_36 = arith.constant 6.000000e+00 : f32
    %122 = vector.broadcast %cst_36 : f32 to vector<1x16xf32>
    %123 = arith.cmpf oge, %56, %122 : vector<1x16xf32>
    %124 = vector.shape_cast %123 : vector<1x16xi1> to vector<1x16xi1>
    %125 = vector.broadcast %124 : vector<1x16xi1> to vector<64x16xi1>
    %126 = arith.select %125, %121, %70 : vector<64x16xi1>, vector<64x16xf32>
    %cst_37 = arith.constant 7.000000e+00 : f32
    %127 = vector.broadcast %cst_37 : f32 to vector<64x16xf32>
    %128 = arith.cmpf oeq, %55, %127 : vector<64x16xf32>
    %cst_38 = arith.constant 0.000000e+00 : f32
    %129 = vector.broadcast %cst_38 : f32 to vector<64x16xf32>
    %130 = arith.select %128, %31, %129 : vector<64x16xi1>, vector<64x16xf32>
    %cst_39 = arith.constant 7.000000e+00 : f32
    %131 = vector.broadcast %cst_39 : f32 to vector<1x16xf32>
    %132 = arith.cmpf oge, %56, %131 : vector<1x16xf32>
    %133 = vector.shape_cast %132 : vector<1x16xi1> to vector<1x16xi1>
    %134 = vector.broadcast %133 : vector<1x16xi1> to vector<64x16xi1>
    %135 = arith.select %134, %130, %70 : vector<64x16xi1>, vector<64x16xf32>
    %cst_40 = arith.constant 8.000000e+00 : f32
    %136 = vector.broadcast %cst_40 : f32 to vector<64x16xf32>
    %137 = arith.cmpf oeq, %55, %136 : vector<64x16xf32>
    %cst_41 = arith.constant 0.000000e+00 : f32
    %138 = vector.broadcast %cst_41 : f32 to vector<64x16xf32>
    %139 = arith.select %137, %31, %138 : vector<64x16xi1>, vector<64x16xf32>
    %cst_42 = arith.constant 8.000000e+00 : f32
    %140 = vector.broadcast %cst_42 : f32 to vector<1x16xf32>
    %141 = arith.cmpf oge, %56, %140 : vector<1x16xf32>
    %142 = vector.shape_cast %141 : vector<1x16xi1> to vector<1x16xi1>
    %143 = vector.broadcast %142 : vector<1x16xi1> to vector<64x16xi1>
    %144 = arith.select %143, %139, %70 : vector<64x16xi1>, vector<64x16xf32>
    %145 = tpu.concatenate %81, %90, %99, %108, %117, %126, %135, %144 in 1 : vector<64x16xf32>, vector<64x16xf32>, vector<64x16xf32>, vector<64x16xf32>, vector<64x16xf32>, vector<64x16xf32>, vector<64x16xf32>, vector<64x16xf32> -> vector<64x128xf32>
    %cst_43 = arith.constant dense<0.000000e+00> : vector<7x128xf32>
    %146 = tpu.matmul %5, %145, %cst_43 {dimension_numbers = #tpu.dot_dimension_numbers<[1], [0], [0], [1], [0, 0, 1, 1], [], []>, precision = #tpu.contract_precision<fp32>} : vector<7x64xf32>, vector<64x128xf32>, vector<7x128xf32> -> vector<7x128xf32>
    %147 = vector.extract_strided_slice %146 {offsets = [0, 0], sizes = [7, 16], strides = [1, 1]} : vector<7x128xf32> to vector<7x16xf32>
    %148 = arith.subf %147, %72 : vector<7x16xf32>
    %c0_44 = arith.constant 0 : index
    %c0_45 = arith.constant 0 : index
    %c0_46 = arith.constant 0 : index
    %c0_47 = arith.constant 0 : index
    %149 = vector.load %arg5[%c0_44, %c0_45, %c0_46, %c0_47] : memref<1x8x7x16xf32, #tpu.memory_space<vmem>>, vector<1x1x7x16xf32>
    %150 = vector.shape_cast %149 : vector<1x1x7x16xf32> to vector<7x16xf32>
    %151 = vector.shape_cast %148 : vector<7x16xf32> to vector<1x1x7x16xf32>
    tpu.vector_store %arg5[%c0_44, %c0_45, %c0_46, %c0_47], %151 {strides = array<i32>} : memref<1x8x7x16xf32, #tpu.memory_space<vmem>>, vector<1x1x7x16xf32>,
    %152 = vector.extract_strided_slice %146 {offsets = [0, 16], sizes = [7, 16], strides = [1, 1]} : vector<7x128xf32> to vector<7x16xf32>
    %153 = arith.subf %152, %72 : vector<7x16xf32>
    %c0_48 = arith.constant 0 : index
    %c1 = arith.constant 1 : index
    %c0_49 = arith.constant 0 : index
    %c0_50 = arith.constant 0 : index
    %154 = vector.load %arg5[%c0_48, %c1, %c0_49, %c0_50] : memref<1x8x7x16xf32, #tpu.memory_space<vmem>>, vector<1x1x7x16xf32>
    %155 = vector.shape_cast %154 : vector<1x1x7x16xf32> to vector<7x16xf32>
    %156 = vector.shape_cast %153 : vector<7x16xf32> to vector<1x1x7x16xf32>
    tpu.vector_store %arg5[%c0_48, %c1, %c0_49, %c0_50], %156 {strides = array<i32>} : memref<1x8x7x16xf32, #tpu.memory_space<vmem>>, vector<1x1x7x16xf32>,
    %157 = vector.extract_strided_slice %146 {offsets = [0, 32], sizes = [7, 16], strides = [1, 1]} : vector<7x128xf32> to vector<7x16xf32>
    %158 = arith.subf %157, %72 : vector<7x16xf32>
    %c0_51 = arith.constant 0 : index
    %c2 = arith.constant 2 : index
    %c0_52 = arith.constant 0 : index
    %c0_53 = arith.constant 0 : index
    %159 = vector.load %arg5[%c0_51, %c2, %c0_52, %c0_53] : memref<1x8x7x16xf32, #tpu.memory_space<vmem>>, vector<1x1x7x16xf32>
    %160 = vector.shape_cast %159 : vector<1x1x7x16xf32> to vector<7x16xf32>
    %161 = vector.shape_cast %158 : vector<7x16xf32> to vector<1x1x7x16xf32>
    tpu.vector_store %arg5[%c0_51, %c2, %c0_52, %c0_53], %161 {strides = array<i32>} : memref<1x8x7x16xf32, #tpu.memory_space<vmem>>, vector<1x1x7x16xf32>,
    %162 = vector.extract_strided_slice %146 {offsets = [0, 48], sizes = [7, 16], strides = [1, 1]} : vector<7x128xf32> to vector<7x16xf32>
    %163 = arith.subf %162, %72 : vector<7x16xf32>
    %c0_54 = arith.constant 0 : index
    %c3 = arith.constant 3 : index
    %c0_55 = arith.constant 0 : index
    %c0_56 = arith.constant 0 : index
    %164 = vector.load %arg5[%c0_54, %c3, %c0_55, %c0_56] : memref<1x8x7x16xf32, #tpu.memory_space<vmem>>, vector<1x1x7x16xf32>
    %165 = vector.shape_cast %164 : vector<1x1x7x16xf32> to vector<7x16xf32>
    %166 = vector.shape_cast %163 : vector<7x16xf32> to vector<1x1x7x16xf32>
    tpu.vector_store %arg5[%c0_54, %c3, %c0_55, %c0_56], %166 {strides = array<i32>} : memref<1x8x7x16xf32, #tpu.memory_space<vmem>>, vector<1x1x7x16xf32>,
    %167 = vector.extract_strided_slice %146 {offsets = [0, 64], sizes = [7, 16], strides = [1, 1]} : vector<7x128xf32> to vector<7x16xf32>
    %168 = arith.subf %167, %72 : vector<7x16xf32>
    %c0_57 = arith.constant 0 : index
    %c4 = arith.constant 4 : index
    %c0_58 = arith.constant 0 : index
    %c0_59 = arith.constant 0 : index
    %169 = vector.load %arg5[%c0_57, %c4, %c0_58, %c0_59] : memref<1x8x7x16xf32, #tpu.memory_space<vmem>>, vector<1x1x7x16xf32>
    %170 = vector.shape_cast %169 : vector<1x1x7x16xf32> to vector<7x16xf32>
    %171 = vector.shape_cast %168 : vector<7x16xf32> to vector<1x1x7x16xf32>
    tpu.vector_store %arg5[%c0_57, %c4, %c0_58, %c0_59], %171 {strides = array<i32>} : memref<1x8x7x16xf32, #tpu.memory_space<vmem>>, vector<1x1x7x16xf32>,
    %172 = vector.extract_strided_slice %146 {offsets = [0, 80], sizes = [7, 16], strides = [1, 1]} : vector<7x128xf32> to vector<7x16xf32>
    %173 = arith.subf %172, %72 : vector<7x16xf32>
    %c0_60 = arith.constant 0 : index
    %c5 = arith.constant 5 : index
    %c0_61 = arith.constant 0 : index
    %c0_62 = arith.constant 0 : index
    %174 = vector.load %arg5[%c0_60, %c5, %c0_61, %c0_62] : memref<1x8x7x16xf32, #tpu.memory_space<vmem>>, vector<1x1x7x16xf32>
    %175 = vector.shape_cast %174 : vector<1x1x7x16xf32> to vector<7x16xf32>
    %176 = vector.shape_cast %173 : vector<7x16xf32> to vector<1x1x7x16xf32>
    tpu.vector_store %arg5[%c0_60, %c5, %c0_61, %c0_62], %176 {strides = array<i32>} : memref<1x8x7x16xf32, #tpu.memory_space<vmem>>, vector<1x1x7x16xf32>,
    %177 = vector.extract_strided_slice %146 {offsets = [0, 96], sizes = [7, 16], strides = [1, 1]} : vector<7x128xf32> to vector<7x16xf32>
    %178 = arith.subf %177, %72 : vector<7x16xf32>
    %c0_63 = arith.constant 0 : index
    %c6 = arith.constant 6 : index
    %c0_64 = arith.constant 0 : index
    %c0_65 = arith.constant 0 : index
    %179 = vector.load %arg5[%c0_63, %c6, %c0_64, %c0_65] : memref<1x8x7x16xf32, #tpu.memory_space<vmem>>, vector<1x1x7x16xf32>
    %180 = vector.shape_cast %179 : vector<1x1x7x16xf32> to vector<7x16xf32>
    %181 = vector.shape_cast %178 : vector<7x16xf32> to vector<1x1x7x16xf32>
    tpu.vector_store %arg5[%c0_63, %c6, %c0_64, %c0_65], %181 {strides = array<i32>} : memref<1x8x7x16xf32, #tpu.memory_space<vmem>>, vector<1x1x7x16xf32>,
    %182 = vector.extract_strided_slice %146 {offsets = [0, 112], sizes = [7, 16], strides = [1, 1]} : vector<7x128xf32> to vector<7x16xf32>
    %183 = arith.subf %182, %72 : vector<7x16xf32>
    %c0_66 = arith.constant 0 : index
    %c7 = arith.constant 7 : index
    %c0_67 = arith.constant 0 : index
    %c0_68 = arith.constant 0 : index
    %184 = vector.load %arg5[%c0_66, %c7, %c0_67, %c0_68] : memref<1x8x7x16xf32, #tpu.memory_space<vmem>>, vector<1x1x7x16xf32>
    %185 = vector.shape_cast %184 : vector<1x1x7x16xf32> to vector<7x16xf32>
    %186 = vector.shape_cast %183 : vector<7x16xf32> to vector<1x1x7x16xf32>
    tpu.vector_store %arg5[%c0_66, %c7, %c0_67, %c0_68], %186 {strides = array<i32>} : memref<1x8x7x16xf32, #tpu.memory_space<vmem>>, vector<1x1x7x16xf32>,
    return
  }
  func.func @transform_0(%arg0: i32, %arg1: i32) -> (i32, i32, i32) {
    %c0_i32 = arith.constant 0 : i32
    %c0_i32_0 = arith.constant 0 : i32
    %c0_i32_1 = arith.constant 0 : i32
    return %arg0, %c0_i32, %c0_i32_0 : i32, i32, i32
  }
  func.func @transform_1(%arg0: i32, %arg1: i32) -> (i32, i32, i32) {
    %c0_i32 = arith.constant 0 : i32
    %c0_i32_0 = arith.constant 0 : i32
    return %arg0, %c0_i32, %arg1 : i32, i32, i32
  }
  func.func @transform_2(%arg0: i32, %arg1: i32) -> (i32, i32, i32) {
    %c0_i32 = arith.constant 0 : i32
    %c0_i32_0 = arith.constant 0 : i32
    %c0_i32_1 = arith.constant 0 : i32
    return %arg0, %c0_i32, %c0_i32_0 : i32, i32, i32
  }
  func.func @transform_3(%arg0: i32, %arg1: i32) -> (i32, i32, i32, i32) {
    %c0_i32 = arith.constant 0 : i32
    %c0_i32_0 = arith.constant 0 : i32
    %c0_i32_1 = arith.constant 0 : i32
    return %arg0, %c0_i32, %c0_i32_0, %arg1 : i32, i32, i32, i32
  }
}

</mosaic_0001>

<bundles_post_ra>
// kernel: tpu_custom_call.1
= control target key start
LH: loop header
LB: loop body
LE: loop exit
PB: predicated region body
PF: predicated region fallthrough
CT: control target
= control target key end

     0   :  { %s2325_s12 = smov 0   ;;  %s2327_s13 = smov 0   ;;  %s3271_s0 = inlined_call_operand.vmem [shape: f32[2,64,3], index: 0, kind: input, shape index: {}]   ;;  %s3272_s1 = inlined_call_operand.vmem [shape: f32[2,3,16], index: 1, kind: input, shape index: {}]   ;;  %s3273_s2 = inlined_call_operand.vmem [shape: f32[2,7,64], index: 2, kind: input, shape index: {}]   ;;  %s3274_s3 = inlined_call_operand.vmem [shape: f32[2,8,7,16], index: 3, kind: output, shape index: {}]  }
   0x1   :  { %s2329_s14 = smov 0  }
   0x2 LB: > { %s25_s15 = sadd.s32 1, %s2287_s13  ;;  %p1897_p0 = scmp.ge.s32.totalorder %s2291_s14, 1  ;;  %s2291_s14 = sphi %s2329_s14, %s13_s14   ;;  %s2287_s13 = sphi %s2327_s13, %s3293_s13   ;;  %s2283_s12 = sphi %s2325_s12, %s3292_s12  }
   0x3   : > { %p27_p1 = scmp.ge.s32.totalorder %s25_s15, 2  ;;  %p174_p2 = scmp.lt.s32.totalorder %s2291_s14, 3 }
   0x5   : > { %s3295_s15 = smov (%p27_p1, %s25_s15), 0  ;;  %p175_p3 = pnand %p1897_p0, %p174_p2 }
   0x6   : > { %p212_p4 = scmp.lt.s32.totalorder (!%p175_p3), %s2283_s12, 1  ;;  %s2297_s24 = smov (!%p175_p3), 32  }
   0x7   : > { %178 = sbr.rel (%p175_p3) target bundleno = 777 (0x309), region = 32  ;;  %s2298_s25 = smov (!%p175_p3), 16  }
   0x8   : > { %s2299_s26 = smov (!%p175_p3), 64   ;;  %s2300_s27 = smov (!%p175_p3), 48  }
   0x9   : > { %s2301_s28 = smov (!%p175_p3), 80   ;;  %s2302_s29 = smov (!%p175_p3), 96  }
   0xa   : > { %s2303_s30 = smov (!%p175_p3), 112  }
   0xc   : > { %v2293_v0 = vmov 0   ;;  %s3297_s12 = smov (!%p212_p4, %s2283_s12), 1  ;;  %v2294_v9 = vmov 1   ;;  %v2295_v10 = vmov 0.0   ;;  %v2296_v11 = vmov 2  }
   0xd   : > { %2129 = vset.pattern.permute.xlu1 %v2293_v0  ;;  %2128 = vset.pattern.permute.xlu0 %v2293_v0  ;;  %s1922_s16 = sshll.u32 %s3297_s12, 6  ;;  %v286_v20 = vlaneseq  ;;  %s1900_s20 = sshll.u32 %s3297_s12, 2  ;;  %vm466_vm0 = vcmask 1040384   ;;  %vm507_vm1 = vcmask 1041408   ;;  %vm548_vm9 = vcmask 1043456  }
   0xe   : > { %s216_s19 = scalar_lea.vmem %s3271_s0, %s1922_s16  ;;  %1978 = vmatprep.subr.mxu0 %v2295_v10  ;;  %1997 = vmatprep.subr.mxu1 %v2295_v10  ;;  %s223_s23 = scalar_lea.vmem %s3272_s1, %s1900_s20 }
   0xf   : > { %v238_v1 = vld [vmem:[%s216_s19 + $0x10] sm:$0xff]  ;;  %v236_v2 = vld [vmem:[%s216_s19] sm:$0xff]  ;;  %v239_v3 = vld [vmem:[%s216_s19 + $0x18] sm:$0xff]  ;;  %v2356_v23 = vshrl.u32 %v286_v20, 7  ;;  %s1901_s4 = sshll.u32 %s3297_s12, 3  ;;  %s3236_s10 = scalar_lea.vmem %s3274_s3, %s1922_s16 }
  0x10   : > { %258 = vperm.xlu1 %2129, %v238_v1   ;;  %248 = vperm.xlu0 %2128, %v236_v2   ;;  %v237_v4 = vld [vmem:[%s216_s19 + $0x8] sm:$0xff]  ;;  %v240_v6 = vld [vmem:[%s216_s19 + $0x20] sm:$0xff]  ;;  %v243_v7 = vld [vmem:[%s216_s19 + $0x38] sm:$0xff]  ;;  %s227_s7 = scalar_lea.vmem %s3273_s2, %s1901_s4 }
  0x11   : > { %v241_v5 = vld [vmem:[%s216_s19 + $0x28] sm:$0xff]  ;;  %v242_v8 = vld [vmem:[%s216_s19 + $0x30] sm:$0xff]  ;;  %v348_v24 = vsub.s32 1, %v2356_v23  ;;  %v2362_v27 = vld [vmem:[%s223_s23] sm:$0x7]  ;;  %v288_v28 = vsub.s32 0, %v2356_v23 }
  0x12   : > { %v408_v32 = vsub.s32 2, %v2356_v23 }
  0x13   : > { %v2366_v29 = vrot.slane %v2362_v27, %v348_v24  ;;  %v289_v33 = vrot.slane %v2362_v27, %v288_v28 }
  0x14   : > { %263 = vperm.xlu1 %2129, %v239_v3   ;;  %253 = vperm.xlu0 %2128, %v237_v4   ;;  %v2375_v38 = vrot.slane %v2362_v27, %v408_v32 }
  0x18   : > { %273 = vperm.xlu1 %2129, %v241_v5   ;;  %268 = vperm.xlu0 %2128, %v240_v6  }
  0x1c   : > { %283 = vperm.xlu1 %2129, %v243_v7   ;;  %278 = vperm.xlu0 %2128, %v242_v8  }
  0x20   : > { %2131 = vset.pattern.permute.xlu1 %v2294_v9  ;;  %2130 = vset.pattern.permute.xlu0 %v2294_v9 }
  0x21   : > { %319 = vperm.xlu1 %2131, %v237_v4   ;;  %315 = vperm.xlu0 %2130, %v236_v2  }
  0x25   : > { %323 = vperm.xlu1 %2131, %v238_v1   ;;  %327 = vperm.xlu0 %2130, %v239_v3  }
  0x29   : > { %331 = vperm.xlu1 %2131, %v240_v6   ;;  %335 = vperm.xlu0 %2130, %v241_v5  }
  0x2d   : > { %339 = vperm.xlu1 %2131, %v242_v8   ;;  %343 = vperm.xlu0 %2130, %v243_v7  }
  0x31   : > { %2132 = vset.pattern.permute.xlu1 %v2296_v11  ;;  %2133 = vset.pattern.permute.xlu0 %v2296_v11 }
  0x32   : > { %375 = vperm.xlu1 %2132, %v236_v2   ;;  %379 = vperm.xlu0 %2133, %v237_v4  }
  0x36   : > { %383 = vperm.xlu1 %2132, %v238_v1   ;;  %391 = vperm.xlu0 %2133, %v240_v6  }
  0x3a   : > { %387 = vperm.xlu1 %2132, %v239_v3   ;;  %399 = vperm.xlu0 %2133, %v242_v8  }
  0x3e   : > { %395 = vperm.xlu1 %2132, %v241_v5  }
  0x42   : > { %403 = vperm.xlu1 %2132, %v243_v7  }
  0x8b   : > { %v259_v12 = vpop.permute.xlu1 %258  ;;  %v249_v13 = vpop.permute.xlu0 %248 }
  0x8c   : > { %v290_v39 = vsub.f32 %v249_v13, %v289_v33  ;;  %v292_v41 = vsub.f32 %v259_v12, %v289_v33 }
  0x8e   : > { %v298_v51 = vmul.f32 %v290_v39, %v290_v39  ;;  %v300_v55 = vmul.f32 %v292_v41, %v292_v41 }
  0x8f   : > { %v264_v14 = vpop.permute.xlu1 %263  ;;  %v254_v15 = vpop.permute.xlu0 %253 }
  0x90   : > { %v291_v40 = vsub.f32 %v254_v15, %v289_v33  ;;  %v293_v42 = vsub.f32 %v264_v14, %v289_v33 }
  0x92   : > { %v299_v52 = vmul.f32 %v291_v40, %v291_v40  ;;  %v301_v56 = vmul.f32 %v293_v42, %v293_v42 }
  0x93   : > { %v274_v16 = vpop.permute.xlu1 %273  ;;  %v269_v17 = vpop.permute.xlu0 %268 }
  0x94   : > { %v295_v46 = vsub.f32 %v274_v16, %v289_v33  ;;  %v294_v47 = vsub.f32 %v269_v17, %v289_v33 }
  0x96   : > { %v303_v63 = vmul.f32 %v295_v46, %v295_v46  ;;  %v302_v1 = vmul.f32 %v294_v47, %v294_v47 }
  0x97   : > { %v284_v18 = vpop.permute.xlu1 %283  ;;  %v279_v19 = vpop.permute.xlu0 %278 }
  0x98   : > { %v297_v11 = vsub.f32 %v284_v18, %v289_v33  ;;  %v296_v12 = vsub.f32 %v279_v19, %v289_v33 }
  0x9c   : > { %v320_v21 = vpop.permute.xlu1 %319  ;;  %v316_v22 = vpop.permute.xlu0 %315 }
  0x9d   : > { %v351_v34 = vsub.f32 %v320_v21, %v2366_v29  ;;  %v350_v35 = vsub.f32 %v316_v22, %v2366_v29 }
  0x9f   : > { %v359_v44 = vmul.f32 %v351_v34, %v351_v34  ;;  %v358_v45 = vmul.f32 %v350_v35, %v350_v35 }
  0xa0   : > { %v324_v25 = vpop.permute.xlu1 %323  ;;  %v328_v26 = vpop.permute.xlu0 %327 }
  0xa1   : > { %v352_v43 = vsub.f32 %v324_v25, %v2366_v29  ;;  %v353_v58 = vsub.f32 %v328_v26, %v2366_v29  ;;  %v367_v59 = vadd.f32 %v359_v44, %v299_v52  ;;  %v366_v60 = vadd.f32 %v358_v45, %v298_v51 }
  0xa3   : > { %v360_v57 = vmul.f32 %v352_v43, %v352_v43  ;;  %v361_v14 = vmul.f32 %v353_v58, %v353_v58 }
  0xa4   : > { %v332_v30 = vpop.permute.xlu1 %331  ;;  %v336_v31 = vpop.permute.xlu0 %335 }
  0xa5   : > { %v354_v48 = vsub.f32 %v332_v30, %v2366_v29  ;;  %v368_v13 = vadd.f32 %v360_v57, %v300_v55  ;;  %v355_v20 = vsub.f32 %v336_v31, %v2366_v29  ;;  %v304_v30 = vmul.f32 %v296_v12, %v296_v12 }
  0xa6   : > { %v369_v34 = vadd.f32 %v361_v14, %v301_v56 }
  0xa7   : > { %v362_v2 = vmul.f32 %v354_v48, %v354_v48  ;;  %v363_v39 = vmul.f32 %v355_v20, %v355_v20 }
  0xa8   : > { %v340_v36 = vpop.permute.xlu1 %339  ;;  %v2372_v37 = vpop.permute.xlu0 %343 }
  0xa9   : > { %v356_v3 = vsub.f32 %v340_v36, %v2366_v29  ;;  %v370_v17 = vadd.f32 %v362_v2, %v302_v1  ;;  %v357_v48 = vsub.f32 %v2372_v37, %v2366_v29  ;;  %v371_v55 = vadd.f32 %v363_v39, %v303_v63 }
  0xab   : > { %v364_v18 = vmul.f32 %v356_v3, %v356_v3  ;;  %v365_v1 = vmul.f32 %v357_v48, %v357_v48 }
  0xad   : > { %v376_v49 = vpop.permute.xlu1 %375  ;;  %v380_v50 = vpop.permute.xlu0 %379  ;;  %v372_v44 = vadd.f32 %v364_v18, %v304_v30 }
  0xae   : > { %v410_v53 = vsub.f32 %v376_v49, %v2375_v38  ;;  %v411_v54 = vsub.f32 %v380_v50, %v2375_v38 }
  0xb0   : > { %v418_v61 = vmul.f32 %v410_v53, %v410_v53  ;;  %v419_v62 = vmul.f32 %v411_v54, %v411_v54 }
  0xb1   : > { %v384_v4 = vpop.permute.xlu1 %383  ;;  %v392_v5 = vpop.permute.xlu0 %391 }
  0xb2   : > { %v426_v6 = vadd.f32 %v418_v61, %v366_v60  ;;  %v427_v7 = vadd.f32 %v419_v62, %v367_v59  ;;  %v412_v8 = vsub.f32 %v384_v4, %v2375_v38  ;;  %v414_v9 = vsub.f32 %v392_v5, %v2375_v38 }
  0xb3   : > { %v305_v62 = vmul.f32 %v297_v11, %v297_v11 }
  0xb4   : > { %vm434_vm2 = vcmp.lt.f32.partialorder %v426_v6, 0.09  ;;  %vm435_vm3 = vcmp.lt.f32.partialorder %v427_v7, 0.09  ;;  %v420_v15 = vmul.f32 %v412_v8, %v412_v8  ;;  %v422_v16 = vmul.f32 %v414_v9, %v414_v9 }
  0xb5   : > { %v2387_v21 = vsel %vm434_vm2, 1.0, %v2295_v10  ;;  %v2390_v22 = vsel %vm435_vm3, 1.0, %v2295_v10  ;;  %v388_v24 = vpop.permute.xlu1 %387  ;;  %v400_v25 = vpop.permute.xlu0 %399  ;;  %v373_v14 = vadd.f32 %v365_v1, %v305_v62 }
  0xb6   : > { %v467_v19 = vrot.slane %v2387_v21, 7  ;;  %v468_v26 = vrot.slane %v2390_v22, 7  ;;  %v428_v28 = vadd.f32 %v420_v15, %v368_v13  ;;  %v430_v32 = vadd.f32 %v422_v16, %v370_v17 }
  0xb7   : > { %v413_v33 = vsub.f32 %v388_v24, %v2375_v38  ;;  %v416_v31 = vsub.f32 %v400_v25, %v2375_v38 }
  0xb8   : > { %v490_v35 = vsel %vm466_vm0, 0.0, %v467_v19  ;;  %v469_v36 = vsel %vm466_vm0, %v467_v19, %v468_v26  ;;  %vm436_vm4 = vcmp.lt.f32.partialorder %v428_v28, 0.09  ;;  %vm438_vm5 = vcmp.lt.f32.partialorder %v430_v32, 0.09 }
  0xb9   : > { %v491_v40 = vadd.f32 %v2387_v21, %v490_v35  ;;  %v492_v41 = vadd.f32 %v2390_v22, %v469_v36  ;;  %v2401_v42 = vsel %vm436_vm4, 1.0, %v2295_v10  ;;  %v396_v43 = vpop.permute.xlu1 %395  ;;  %v421_v46 = vmul.f32 %v413_v33, %v413_v33 }
  0xba   : > { %v470_v45 = vrot.slane %v2401_v42, 7  ;;  %v424_v47 = vmul.f32 %v416_v31, %v416_v31  ;;  %v415_v50 = vsub.f32 %v396_v43, %v2375_v38  ;;  %v2411_v59 = vsel %vm438_vm5, 1.0, %v2295_v10 }
  0xbb   : > { %v508_v49 = vrot.slane %v491_v40, 6  ;;  %v509_v51 = vrot.slane %v492_v41, 6  ;;  %v429_v53 = vadd.f32 %v421_v46, %v369_v34  ;;  %v474_v4 = vrot.slane %v2411_v59, 7 }
  0xbc   : > { %v471_v52 = vsel %vm466_vm0, %v468_v26, %v470_v45  ;;  %v432_v54 = vadd.f32 %v424_v47, %v372_v44  ;;  %v423_v57 = vmul.f32 %v415_v50, %v415_v50 }
  0xbd   : > { %v493_v56 = vadd.f32 %v2401_v42, %v471_v52  ;;  %v531_v58 = vsel %vm507_vm1, 0.0, %v508_v49  ;;  %vm437_vm6 = vcmp.lt.f32.partialorder %v429_v53, 0.09  ;;  %v404_v29 = vpop.permute.xlu1 %403  ;;  %v510_v63 = vsel %vm507_vm1, %v508_v49, %v509_v51 }
  0xbe   : > { %v2414_v60 = vsel %vm437_vm6, 1.0, %v2295_v10  ;;  %vm440_vm7 = vcmp.lt.f32.partialorder %v432_v54, 0.09  ;;  %v431_v61 = vadd.f32 %v423_v57, %v371_v55  ;;  %v417_v5 = vsub.f32 %v404_v29, %v2375_v38 }
  0xbf   : > { %v511_v37 = vrot.slane %v493_v56, 6  ;;  %v472_v2 = vrot.slane %v2414_v60, 7  ;;  %v532_v6 = vadd.f32 %v531_v58, %v491_v40  ;;  %v2423_v9 = vsel %vm440_vm7, 1.0, %v2295_v10 }
  0xc0   : > { %vm439_vm8 = vcmp.lt.f32.partialorder %v431_v61, 0.09  ;;  %v533_v11 = vadd.f32 %v510_v63, %v492_v41  ;;  %v425_v17 = vmul.f32 %v417_v5, %v417_v5  ;;  %v478_v24 = vrot.slane %v2423_v9, 7 }
  0xc1   : > { %v512_v3 = vsel %vm507_vm1, %v509_v51, %v511_v37  ;;  %v473_v8 = vsel %vm466_vm0, %v470_v45, %v472_v2  ;;  %v475_v12 = vsel %vm466_vm0, %v472_v2, %v474_v4  ;;  %v2429_v16 = vsel %vm439_vm8, 1.0, %v2295_v10 }
  0xc2   : > { %v534_v7 = vadd.f32 %v512_v3, %v493_v56  ;;  %v494_v13 = vadd.f32 %v2414_v60, %v473_v8  ;;  %v495_v15 = vadd.f32 %v2411_v59, %v475_v12  ;;  %v476_v25 = vrot.slane %v2429_v16, 7 }
  0xc3   : > { %v549_v18 = vrot.slane %v532_v6, 4  ;;  %v433_v26 = vadd.f32 %v425_v17, %v373_v14  ;;  %v550_v28 = vrot.slane %v533_v11, 4 }
  0xc4   : > { %v552_v38 = vrot.slane %v534_v7, 4  ;;  %v513_v20 = vrot.slane %v494_v13, 6  ;;  %v515_v19 = vrot.slane %v495_v15, 6  ;;  %v477_v32 = vsel %vm466_vm0, %v474_v4, %v476_v25 }
  0xc5   : > { %v479_v33 = vsel %vm466_vm0, %v476_v25, %v478_v24  ;;  %v496_v35 = vadd.f32 %v2429_v16, %v477_v32  ;;  %vm441_vm10 = vcmp.lt.f32.partialorder %v433_v26, 0.09  ;;  %v551_v46 = vsel %vm548_vm9, %v549_v18, %v550_v28 }
  0xc6   : > { %v514_v30 = vsel %vm507_vm1, %v511_v37, %v513_v20  ;;  %v516_v31 = vsel %vm507_vm1, %v513_v20, %v515_v19  ;;  %v497_v36 = vadd.f32 %v2423_v9, %v479_v33  ;;  %v553_v39 = vsel %vm548_vm9, %v550_v28, %v552_v38 }
  0xc7   : > { %v535_v34 = vadd.f32 %v514_v30, %v494_v13  ;;  %v536_v40 = vadd.f32 %v516_v31, %v495_v15  ;;  %v517_v43 = vrot.slane %v496_v35, 6  ;;  %v2441_v45 = vsel %vm441_vm10, 1.0, %v2295_v10 }
  0xc8   : > { %v519_v44 = vrot.slane %v497_v36, 6  ;;  %v480_v48 = vrot.slane %v2441_v45, 7  ;;  %v575_v49 = vadd.f32 %v553_v39, %v534_v7  ;;  %v574_v57 = vadd.f32 %v551_v46, %v533_v11 }
  0xc9   : > { %v554_v41 = vrot.slane %v535_v34, 4  ;;  %v556_v47 = vrot.slane %v536_v40, 4  ;;  %v518_v51 = vsel %vm507_vm1, %v515_v19, %v517_v43  ;;  %v572_v2 = vsel %vm548_vm9, 0.0, %v549_v18 }
  0xca   : > { %v520_v52 = vsel %vm507_vm1, %v517_v43, %v519_v44  ;;  %v537_v55 = vadd.f32 %v518_v51, %v496_v35  ;;  %v481_v29 = vsel %vm466_vm0, %v478_v24, %v480_v48  ;;  %v583_v1 = vadd.f32 %v575_v49, %v574_v57 }
  0xcb   : > { %v555_v50 = vsel %vm548_vm9, %v552_v38, %v554_v41  ;;  %v557_v53 = vsel %vm548_vm9, %v554_v41, %v556_v47  ;;  %v538_v56 = vadd.f32 %v520_v52, %v497_v36  ;;  %v498_v62 = vadd.f32 %v2441_v45, %v481_v29 }
  0xcc   : > { %v576_v54 = vadd.f32 %v555_v50, %v535_v34  ;;  %v577_v58 = vadd.f32 %v557_v53, %v536_v40  ;;  %v558_v37 = vrot.slane %v537_v55, 4  ;;  %v2455_v13 = vadd.f32 %v572_v2, %v532_v6 }
  0xcd   : > { %v560_v61 = vrot.slane %v538_v56, 4  ;;  %v521_v5 = vrot.slane %v498_v62, 6  ;;  %v2471_v32 = vsub.s32 7, %v2356_v23 }
  0xce   : > { %v585_v63 = vadd.f32 %v577_v58, %v576_v54  ;;  %v559_v3 = vsel %vm548_vm9, %v556_v47, %v558_v37  ;;  %v584_v38 = vadd.f32 %v576_v54, %v575_v49  ;;  %v2458_v20 = vadd.f32 %v583_v1, %v2455_v13 }
  0xcf   : > { %v561_v4 = vsel %vm548_vm9, %v558_v37, %v560_v61  ;;  %v578_v8 = vadd.f32 %v559_v3, %v537_v55  ;;  %v522_v11 = vsel %vm507_vm1, %v519_v44, %v521_v5  ;;  %v2468_v6 = vadd.f32 %v574_v57, %v2455_v13 }
  0xd0   : > { %v593_v7 = vadd.f32 %v585_v63, %v583_v1  ;;  %v579_v12 = vadd.f32 %v561_v4, %v538_v56  ;;  %v539_v17 = vadd.f32 %v522_v11, %v498_v62  ;;  %vm640_vm12 = vcmp.eq.f32.partialorder %v2458_v20, 1.0 }
  0xd1   : > { %v586_v14 = vadd.f32 %v578_v8, %v577_v58  ;;  %v2481_v34 = vadd.f32 %v584_v38, %v2468_v6  ;;  %v2499_v41 = vsel %vm640_vm12, %v2401_v42, 0.0 }
  0xd2   : > { %v587_v15 = vadd.f32 %v579_v12, %v578_v8  ;;  %v2461_v24 = vadd.f32 %v593_v7, %v2455_v13  ;;  %v562_v18 = vrot.slane %v539_v17, 4 }
  0xd3   : > { %v594_v19 = vadd.f32 %v586_v14, %v584_v38 }
  0xd4   : > { %v595_v25 = vadd.f32 %v587_v15, %v585_v63  ;;  %v563_v28 = vsel %vm548_vm9, %v560_v61, %v562_v18  ;;  %vm642_vm11 = vcmp.eq.f32.partialorder %v2461_v24, 1.0  ;;  %vm675_vm13 = vcmp.eq.f32.partialorder %v2461_v24, 2.0 }
  0xd5   : > { %v580_v30 = vadd.f32 %v563_v28, %v539_v17  ;;  %v2476_v33 = vadd.f32 %v594_v19, %v2468_v6  ;;  %vm706_vm14 = vcmp.eq.f32.partialorder %v2461_v24, 3.0  ;;  %v650_v36 = vsel %vm642_vm11, %v2411_v59, 0.0 }
  0xd6   : > { %v2464_v26 = vadd.f32 %v595_v25, %v2458_v20  ;;  %v2491_v39 = vsel %vm675_vm13, %v2411_v59, 0.0  ;;  %v2494_v40 = vsel %vm706_vm14, %v2411_v59, 0.0 }
  0xd7   : > { %v588_v31 = vadd.f32 %v580_v30, %v579_v12  ;;  %vm643_vm5 = vcmp.eq.f32.partialorder %v2476_v33, 1.0  ;;  %vm676_vm10 = vcmp.eq.f32.partialorder %v2476_v33, 2.0 }
  0xd8   : > { %vm644_vm15 = vcmp.eq.f32.partialorder %v2464_v26, 1.0  ;;  %vm708_vm0 = vcmp.eq.f32.partialorder %v2464_v26, 3.0  ;;  %vm677_vm1 = vcmp.eq.f32.partialorder %v2464_v26, 2.0  ;;  %vm770_vm2 = vcmp.eq.f32.partialorder %v2464_v26, 5.0 }
  0xd9   : > { %v596_v35 = vadd.f32 %v588_v31, %v586_v14  ;;  %vm739_vm3 = vcmp.eq.f32.partialorder %v2464_v26, 4.0  ;;  %vm801_vm4 = vcmp.eq.f32.partialorder %v2464_v26, 6.0  ;;  %v652_v44 = vsel %vm644_vm15, %v2423_v9, 0.0 }
  0xda   : > { %v716_v46 = vsel %vm708_vm0, %v2423_v9, 0.0  ;;  %v685_v47 = vsel %vm677_vm1, %v2423_v9, 0.0  ;;  %v778_v48 = vsel %vm770_vm2, %v2423_v9, 0.0  ;;  %v2510_v49 = vsel %vm739_vm3, %v2423_v9, 0.0 }
  0xdb   : > { %v2502_v43 = vadd.f32 %v596_v35, %v2481_v34  ;;  %v2513_v50 = vsel %vm801_vm4, %v2423_v9, 0.0  ;;  %v651_v53 = vsel %vm643_vm5, %v2429_v16, 0.0  ;;  %vm832_vm1 = vcmp.eq.f32.partialorder %v2464_v26, 7.0 }
  0xdc   : > { %vm707_vm2 = vcmp.eq.f32.partialorder %v2476_v33, 3.0 }
  0xdd   : > { %vm645_vm6 = vcmp.eq.f32.partialorder %v2502_v43, 1.0  ;;  %vm654_vm7 = vcmp.ge.f32.partialorder %v2502_v43, 1.0  ;;  %vm709_vm8 = vcmp.eq.f32.partialorder %v2502_v43, 3.0  ;;  %vm718_vm9 = vcmp.ge.f32.partialorder %v2502_v43, 3.0 }
  0xde   : > { %v655_v51 = vsel %vm654_vm7, 1, %v2293_v0  ;;  %v719_v52 = vsel %vm718_vm9, 1, %v2293_v0  ;;  %vm678_vm11 = vcmp.eq.f32.partialorder %v2502_v43, 2.0  ;;  %vm687_vm12 = vcmp.ge.f32.partialorder %v2502_v43, 2.0 }
  0xdf   : > { %v659_v54 = vrot.slane %v655_v51, %v2471_v32  ;;  %v723_v55 = vrot.slane %v719_v52, %v2471_v32  ;;  %v653_v56 = vsel %vm645_vm6, %v2441_v45, 0.0  ;;  %v717_v57 = vsel %vm709_vm8, %v2441_v45, 0.0 }
  0xe0   : > { %v688_v58 = vsel %vm687_vm12, 1, %v2293_v0  ;;  %vm780_vm13 = vcmp.ge.f32.partialorder %v2502_v43, 5.0  ;;  %vm771_vm0 = vcmp.eq.f32.partialorder %v2502_v43, 5.0  ;;  %v686_v63 = vsel %vm678_vm11, %v2441_v45, 0.0 }
  0xe1   : > { %vm2531_vm14 = vcmp.eq.s32.totalorder %v659_v54, 1  ;;  %vm2535_vm15 = vcmp.eq.s32.totalorder %v723_v55, 1  ;;  %v692_v61 = vrot.slane %v688_v58, %v2471_v32  ;;  %v781_v2 = vsel %vm780_vm13, 1, %v2293_v0 }
  0xe2   : > { %v2543_v62 = vsel %vm2531_vm14, %v652_v44, 0.0  ;;  %v2547_v1 = vsel %vm2531_vm14, %v653_v56, 0.0  ;;  %v785_v7 = vrot.slane %v781_v2, %v2471_v32  ;;  %v779_v14 = vsel %vm771_vm0, %v2441_v45, 0.0 }
  0xe3   : > { %v731_v3 = vsel %vm2535_vm15, %v716_v46, %v2543_v62  ;;  %v732_v4 = vsel %vm2535_vm15, %v717_v57, %v2547_v1  ;;  %vm2559_vm3 = vcmp.eq.s32.totalorder %v692_v61, 1  ;;  %vm740_vm5 = vcmp.eq.f32.partialorder %v2502_v43, 4.0 }
  0xe4   : > { %v2139_v8 = vpack.i.bf16 %v731_v3, %v732_v4  ;;  %v700_v12 = vsel %vm2559_vm3, %v685_v47, %v2543_v62  ;;  %v701_v11 = vsel %vm2559_vm3, %v686_v63, %v2547_v1  ;;  %vm2571_vm4 = vcmp.eq.s32.totalorder %v785_v7, 1 }
  0xe5   : > { %v2134_v15 = vpack.i.bf16 %v700_v12, %v701_v11  ;;  %vm749_vm6 = vcmp.ge.f32.partialorder %v2502_v43, 4.0  ;;  %v793_v38 = vsel %vm2571_vm4, %v778_v48, %v2543_v62  ;;  %v794_v25 = vsel %vm2571_vm4, %v779_v14, %v2547_v1 }
  0xe6   : > { %2140 = vrot.lane.b32.xlu1 %v2139_v8, %s2297_s24  ;;  %v750_v18 = vsel %vm749_vm6, 1, %v2293_v0  ;;  %vm802_vm7 = vcmp.eq.f32.partialorder %v2502_v43, 6.0  ;;  %vm811_vm8 = vcmp.ge.f32.partialorder %v2502_v43, 6.0  ;;  %v2591_v28 = vsel %vm2531_vm14, %v650_v36, 0.0 }
  0xe7   : > { %2135 = vrot.lane.b32.xlu0 %v2134_v15, %s2298_s25  ;;  %v754_v19 = vrot.slane %v750_v18, %v2471_v32  ;;  %vm863_vm9 = vcmp.eq.f32.partialorder %v2464_v26, 8.0  ;;  %vm737_vm11 = vcmp.eq.f32.partialorder %v2461_v24, 4.0  ;;  %vm641_vm12 = vcmp.eq.f32.partialorder %v2481_v34, 1.0 }
  0xe8   : > { %v2149_v30 = vpack.i.bf16 %v793_v38, %v794_v25  ;;  %v748_v31 = vsel %vm740_vm5, %v2441_v45, 0.0  ;;  %v812_v35 = vsel %vm811_vm8, 1, %v2293_v0  ;;  %v684_v44 = vsel %vm676_vm10, %v2429_v16, 0.0 }
  0xe9   : > { %vm2603_vm13 = vcmp.eq.s32.totalorder %v754_v19, 1  ;;  %v810_v46 = vsel %vm802_vm7, %v2441_v45, 0.0  ;;  %v816_v47 = vrot.slane %v812_v35, %v2471_v32  ;;  %v2611_v48 = vsel %vm2531_vm14, %v651_v53, 0.0 }
  0xea   : > { %2150 = vrot.lane.b32.xlu1 %v2149_v30, %s2299_s26  ;;  %v762_v51 = vsel %vm2603_vm13, %v2510_v49, %v2543_v62  ;;  %v763_v52 = vsel %vm2603_vm13, %v748_v31, %v2547_v1  ;;  %v698_v54 = vsel %vm2559_vm3, %v2491_v39, %v2591_v28  ;;  %vm842_vm10 = vcmp.ge.f32.partialorder %v2502_v43, 7.0 }
  0xeb   : > { %vm673_vm0 = vcmp.eq.f32.partialorder %v2458_v20, 2.0  ;;  %v2144_v53 = vpack.i.bf16 %v762_v51, %v763_v52  ;;  %vm2627_vm5 = vcmp.eq.s32.totalorder %v816_v47, 1  ;;  %vm833_vm6 = vcmp.eq.f32.partialorder %v2502_v43, 7.0 }
  0xec   : > { %v843_v49 = vsel %vm842_vm10, 1, %v2293_v0  ;;  %v824_v56 = vsel %vm2627_vm5, %v2513_v50, %v2543_v62  ;;  %v825_v39 = vsel %vm2627_vm5, %v810_v46, %v2547_v1  ;;  %v699_v57 = vsel %vm2559_vm3, %v684_v44, %v2611_v48 }
  0xed   : > { %v847_v58 = vrot.slane %v843_v49, %v2471_v32  ;;  %2145 = vrot.lane.b32.xlu0 %v2144_v53, %s2300_s27  ;;  %v2159_v61 = vpack.i.bf16 %v824_v56, %v825_v39  ;;  %v840_v63 = vsel %vm832_vm1, %v2423_v9, 0.0  ;;  %v715_v50 = vsel %vm707_vm2, %v2429_v16, 0.0 }
  0xee   : > { %vm873_vm7 = vcmp.ge.f32.partialorder %v2502_v43, 8.0  ;;  %v841_v2 = vsel %vm833_vm6, %v2441_v45, 0.0  ;;  %vm864_vm10 = vcmp.eq.f32.partialorder %v2502_v43, 8.0  ;;  %v2154_v7 = vpack.i.bf16 %v698_v54, %v699_v57 }
  0xef   : > { %vm2653_vm8 = vcmp.eq.s32.totalorder %v847_v58, 1  ;;  %v874_v4 = vsel %vm873_vm7, 1, %v2293_v0  ;;  %2160 = vrot.lane.b32.xlu1 %v2159_v61, %s2301_s28  ;;  %v729_v43 = vsel %vm2535_vm15, %v2494_v40, %v2591_v28  ;;  %v730_v0 = vsel %vm2535_vm15, %v715_v50, %v2611_v48 }
  0xf0   : > { %v855_v8 = vsel %vm2653_vm8, %v840_v63, %v2543_v62  ;;  %v856_v12 = vsel %vm2653_vm8, %v841_v2, %v2547_v1  ;;  %v878_v11 = vrot.slane %v874_v4, %v2471_v32  ;;  %vm738_vm1 = vcmp.eq.f32.partialorder %v2476_v33, 4.0 }
  0xf1   : > { %vm674_vm2 = vcmp.eq.f32.partialorder %v2481_v34, 2.0  ;;  %2155 = vrot.lane.b32.xlu0 %v2154_v7, %s2298_s25  ;;  %v2169_v14 = vpack.i.bf16 %v855_v8, %v856_v12  ;;  %v871_v32 = vsel %vm863_vm9, %v2423_v9, 0.0  ;;  %v872_v15 = vsel %vm864_vm10, %v2441_v45, 0.0 }
  0xf2   : > { %vm2681_vm6 = vcmp.eq.s32.totalorder %v878_v11, 1  ;;  %v745_v18 = vsel %vm737_vm11, %v2411_v59, 0.0  ;;  %v649_v9 = vsel %vm641_vm12, %v2414_v60, 0.0  ;;  %v2164_v45 = vpack.i.bf16 %v729_v43, %v730_v0 }
  0xf3   : > { %v886_v40 = vsel %vm2681_vm6, %v871_v32, %v2543_v62  ;;  %v887_v25 = vsel %vm2681_vm6, %v872_v15, %v2547_v1  ;;  %2170 = vrot.lane.b32.xlu1 %v2169_v14, %s2302_s29  ;;  %v746_v26 = vsel %vm738_vm1, %v2429_v16, 0.0  ;;  %v2702_v19 = vsel %vm2531_vm14, %v2499_v41, 0.0 }
  0xf4   : > { %v2706_v30 = vsel %vm2531_vm14, %v649_v9, 0.0  ;;  %v760_v31 = vsel %vm2603_vm13, %v745_v18, %v2591_v28  ;;  %v761_v35 = vsel %vm2603_vm13, %v746_v26, %v2611_v48  ;;  %vm768_vm9 = vcmp.eq.f32.partialorder %v2461_v24, 5.0 }
  0xf5   : > { %vm769_vm11 = vcmp.eq.f32.partialorder %v2476_v33, 5.0  ;;  %2165 = vrot.lane.b32.xlu0 %v2164_v45, %s2297_s24  ;;  %v2179_v41 = vpack.i.bf16 %v886_v40, %v887_v25  ;;  %v681_v44 = vsel %vm673_vm0, %v2401_v42, 0.0  ;;  %v682_v46 = vsel %vm674_vm2, %v2414_v60, 0.0 }
  0xf6   : > { %v696_v47 = vsel %vm2559_vm3, %v681_v44, %v2702_v19  ;;  %v697_v51 = vsel %vm2559_vm3, %v682_v46, %v2706_v30  ;;  %vm704_vm12 = vcmp.eq.f32.partialorder %v2458_v20, 3.0  ;;  %vm705_vm7 = vcmp.eq.f32.partialorder %v2481_v34, 3.0 }
  0xf7   : > { %2180 = vrot.lane.b32.xlu1 %v2179_v41, %s2303_s30  ;;  %v2174_v52 = vpack.i.bf16 %v760_v31, %v761_v35  ;;  %v776_v54 = vsel %vm768_vm9, %v2411_v59, 0.0  ;;  %v777_v53 = vsel %vm769_vm11, %v2429_v16, 0.0  ;;  %vm614_vm0 = vcmp.eq.s32.totalorder %v2356_v23, 0 }
  0xf8   : > { %v791_v49 = vsel %vm2571_vm4, %v776_v54, %v2591_v28  ;;  %v792_v56 = vsel %vm2571_vm4, %v777_v53, %v2611_v48  ;;  %vm799_vm10 = vcmp.eq.f32.partialorder %v2461_v24, 6.0  ;;  %vm800_vm1 = vcmp.eq.f32.partialorder %v2476_v33, 6.0 }
  0xf9   : > { %2175 = vrot.lane.b32.xlu0 %v2174_v52, %s2300_s27  ;;  %v2189_v39 = vpack.i.bf16 %v696_v47, %v697_v51  ;;  %v712_v57 = vsel %vm704_vm12, %v2401_v42, 0.0  ;;  %v713_v58 = vsel %vm705_vm7, %v2414_v60, 0.0  ;;  %vm735_vm9 = vcmp.eq.f32.partialorder %v2458_v20, 4.0 }
  0xfa   : > { %v727_v61 = vsel %vm2535_vm15, %v712_v57, %v2702_v19  ;;  %v728_v63 = vsel %vm2535_vm15, %v713_v58, %v2706_v30  ;;  %vm736_vm11 = vcmp.eq.f32.partialorder %v2481_v34, 4.0  ;;  %v2184_v50 = vpack.i.bf16 %v791_v49, %v792_v56 }
  0xfb   : > { %2190 = vrot.lane.b32.xlu1 %v2189_v39, %s2298_s25  ;;  %v807_v2 = vsel %vm799_vm10, %v2411_v59, 0.0  ;;  %v808_v4 = vsel %vm800_vm1, %v2429_v16, 0.0  ;;  %vm830_vm12 = vcmp.eq.f32.partialorder %v2461_v24, 7.0  ;;  %vm831_vm7 = vcmp.eq.f32.partialorder %v2476_v33, 7.0 }
  0xfc   : > { %v822_v7 = vsel %vm2627_vm5, %v807_v2, %v2591_v28  ;;  %v823_v8 = vsel %vm2627_vm5, %v808_v4, %v2611_v48  ;;  %vm766_vm2 = vcmp.eq.f32.partialorder %v2458_v20, 5.0  ;;  %v2199_v12 = vpack.i.bf16 %v727_v61, %v728_v63 }
  0xfd   : > { %2185 = vrot.lane.b32.xlu0 %v2184_v50, %s2299_s26  ;;  %v743_v11 = vsel %vm735_vm9, %v2401_v42, 0.0  ;;  %v744_v43 = vsel %vm736_vm11, %v2414_v60, 0.0  ;;  %vm767_vm10 = vcmp.eq.f32.partialorder %v2481_v34, 5.0  ;;  %v838_v32 = vsel %vm830_vm12, %v2411_v59, 0.0 }
  0xfe   : > { %v758_v0 = vsel %vm2603_vm13, %v743_v11, %v2702_v19  ;;  %v759_v14 = vsel %vm2603_vm13, %v744_v43, %v2706_v30  ;;  %vm639_vm1 = vcmp.eq.f32.partialorder %v2468_v6, 1.0  ;;  %v2194_v15 = vpack.i.bf16 %v822_v7, %v823_v8 }
  0xff   : > { %2200 = vrot.lane.b32.xlu1 %v2199_v12, %s2297_s24  ;;  %v839_v40 = vsel %vm831_vm7, %v2429_v16, 0.0  ;;  %v853_v25 = vsel %vm2653_vm8, %v838_v32, %v2591_v28  ;;  %v774_v18 = vsel %vm766_vm2, %v2401_v42, 0.0  ;;  %v775_v45 = vsel %vm767_vm10, %v2414_v60, 0.0 }
 0x100   : > { %v854_v9 = vsel %vm2653_vm8, %v839_v40, %v2611_v48  ;;  %vm861_vm9 = vcmp.eq.f32.partialorder %v2461_v24, 8.0  ;;  %vm862_vm11 = vcmp.eq.f32.partialorder %v2476_v33, 8.0  ;;  %v2209_v26 = vpack.i.bf16 %v758_v0, %v759_v14 }
 0x101   : > { %2195 = vrot.lane.b32.xlu0 %v2194_v15, %s2301_s28  ;;  %v789_v31 = vsel %vm2571_vm4, %v774_v18, %v2702_v19  ;;  %v790_v35 = vsel %vm2571_vm4, %v775_v45, %v2706_v30  ;;  %v1912_v41 = vsel %vm614_vm0, 1.0, %v2295_v10  ;;  %vm797_vm2 = vcmp.eq.f32.partialorder %v2458_v20, 6.0 }
 0x102   : > { %vm798_vm12 = vcmp.eq.f32.partialorder %v2481_v34, 6.0  ;;  %vm3291_vm7 = vcmp.eq.f32.partialorder %v2455_v13, 1.0  ;;  %v647_v33 = vsel %vm639_vm1, %v2390_v22, 0.0  ;;  %v2204_v44 = vpack.i.bf16 %v853_v25, %v854_v9 }
 0x103   : > { %v646_v24 = vsel %vm3291_vm7, %v2387_v21, 0.0  ;;  %2210 = vrot.lane.b32.xlu1 %v2209_v26, %s2300_s27  ;;  %v869_v46 = vsel %vm861_vm9, %v2411_v59, 0.0  ;;  %v870_v23 = vsel %vm862_vm11, %v2429_v16, 0.0  ;;  %vm671_vm0 = vcmp.eq.f32.partialorder %v2455_v13, 2.0 }
 0x104   : > { %v2219_v47 = vpack.i.bf16 %v789_v31, %v790_v35  ;;  %v884_v51 = vsel %vm2681_vm6, %v869_v46, %v2591_v28  ;;  %v885_v52 = vsel %vm2681_vm6, %v870_v23, %v2611_v48  ;;  %vm672_vm10 = vcmp.eq.f32.partialorder %v2468_v6, 2.0 }
 0x105   : > { %2205 = vrot.lane.b32.xlu0 %v2204_v44, %s2302_s29  ;;  %v805_v54 = vsel %vm797_vm2, %v2401_v42, 0.0  ;;  %v806_v59 = vsel %vm798_vm12, %v2414_v60, 0.0  ;;  %v2825_v16 = vsel %vm2531_vm14, %v646_v24, %v1912_v41  ;;  %v2829_v53 = vsel %vm2531_vm14, %v647_v33, 0.0 }
 0x106   : > { %v820_v49 = vsel %vm2627_vm5, %v805_v54, %v2702_v19  ;;  %v821_v56 = vsel %vm2627_vm5, %v806_v59, %v2706_v30  ;;  %vm828_vm1 = vcmp.eq.f32.partialorder %v2458_v20, 7.0  ;;  %vm829_vm9 = vcmp.eq.f32.partialorder %v2481_v34, 7.0 }
 0x107   : > { %2220 = vrot.lane.b32.xlu1 %v2219_v47, %s2299_s26  ;;  %v2214_v39 = vpack.i.bf16 %v884_v51, %v885_v52  ;;  %v679_v29 = vsel %vm671_vm0, %v2387_v21, 0.0  ;;  %v680_v57 = vsel %vm672_vm10, %v2390_v22, 0.0  ;;  %vm702_vm14 = vcmp.eq.f32.partialorder %v2455_v13, 3.0 }
 0x108   : > { %v694_v58 = vsel %vm2559_vm3, %v679_v29, %v2825_v16  ;;  %v695_v61 = vsel %vm2559_vm3, %v680_v57, %v2829_v53  ;;  %vm703_vm11 = vcmp.eq.f32.partialorder %v2468_v6, 3.0  ;;  %v2229_v63 = vpack.i.bf16 %v820_v49, %v821_v56 }
 0x109   : > { %2215 = vrot.lane.b32.xlu0 %v2214_v39, %s2303_s30  ;;  %v836_v50 = vsel %vm828_vm1, %v2401_v42, 0.0  ;;  %v837_v2 = vsel %vm829_vm9, %v2414_v60, 0.0  ;;  %vm859_vm3 = vcmp.eq.f32.partialorder %v2458_v20, 8.0  ;;  %vm860_vm2 = vcmp.eq.f32.partialorder %v2481_v34, 8.0 }
 0x10a   : > { %v851_v4 = vsel %vm2653_vm8, %v836_v50, %v2702_v19  ;;  %v852_v5 = vsel %vm2653_vm8, %v837_v2, %v2706_v30  ;;  %v2224_v7 = vpack.i.bf16 %v694_v58, %v695_v61  ;;  %v710_v8 = vsel %vm702_vm14, %v2387_v21, 0.0 }
 0x10b   : > { %2230 = vrot.lane.b32.xlu1 %v2229_v63, %s2301_s28  ;;  %v711_v12 = vsel %vm703_vm11, %v2390_v22, 0.0  ;;  %v725_v11 = vsel %vm2535_vm15, %v710_v8, %v2825_v16  ;;  %vm733_vm12 = vcmp.eq.f32.partialorder %v2455_v13, 4.0  ;;  %vm734_vm7 = vcmp.eq.f32.partialorder %v2468_v6, 4.0 }
 0x10c   : > { %v726_v43 = vsel %vm2535_vm15, %v711_v12, %v2829_v53  ;;  %v2239_v20 = vpack.i.bf16 %v851_v4, %v852_v5  ;;  %v867_v34 = vsel %vm859_vm3, %v2401_v42, 0.0  ;;  %v868_v0 = vsel %vm860_vm2, %v2414_v60, 0.0 }
 0x10d   : > { %2225 = vrot.lane.b32.xlu0 %v2224_v7, %s2298_s25  ;;  %v882_v14 = vsel %vm2681_vm6, %v867_v34, %v2702_v19  ;;  %v883_v37 = vsel %vm2681_vm6, %v868_v0, %v2706_v30  ;;  %vm795_vm15 = vcmp.eq.f32.partialorder %v2455_v13, 6.0  ;;  %vm796_vm0 = vcmp.eq.f32.partialorder %v2468_v6, 6.0 }
 0x10e   : > { %v2234_v32 = vpack.i.bf16 %v725_v11, %v726_v43  ;;  %v741_v15 = vsel %vm733_vm12, %v2387_v21, 0.0  ;;  %v742_v42 = vsel %vm734_vm7, %v2390_v22, 0.0  ;;  %vm764_vm10 = vcmp.eq.f32.partialorder %v2455_v13, 5.0 }
 0x10f   : > { %2240 = vrot.lane.b32.xlu1 %v2239_v20, %s2302_s29  ;;  %v756_v60 = vsel %vm2603_vm13, %v741_v15, %v2825_v16  ;;  %v757_v40 = vsel %vm2603_vm13, %v742_v42, %v2829_v53  ;;  %vm765_vm1 = vcmp.eq.f32.partialorder %v2468_v6, 5.0  ;;  %v2249_v25 = vpack.i.bf16 %v882_v14, %v883_v37 }
 0x110   : > { %v803_v18 = vsel %vm795_vm15, %v2387_v21, 0.0  ;;  %v804_v9 = vsel %vm796_vm0, %v2390_v22, 0.0  ;;  %v2244_v26 = vpack.i.bf16 %v756_v60, %v757_v40  ;;  %v772_v31 = vsel %vm764_vm10, %v2387_v21, 0.0 }
 0x111   : > { %2235 = vrot.lane.b32.xlu0 %v2234_v32, %s2297_s24  ;;  %v818_v45 = vsel %vm2627_vm5, %v803_v18, %v2825_v16  ;;  %v819_v36 = vsel %vm2627_vm5, %v804_v9, %v2829_v53  ;;  %v773_v35 = vsel %vm765_vm1, %v2390_v22, 0.0  ;;  %v787_v41 = vsel %vm2571_vm4, %v772_v31, %v2825_v16 }
 0x112   : > { %v788_v24 = vsel %vm2571_vm4, %v773_v35, %v2829_v53  ;;  %vm826_vm13 = vcmp.eq.f32.partialorder %v2455_v13, 7.0  ;;  %vm827_vm9 = vcmp.eq.f32.partialorder %v2468_v6, 7.0  ;;  %v2259_v55 = vpack.i.bf16 %v818_v45, %v819_v36 }
 0x113   : > { %2250 = vrot.lane.b32.xlu1 %v2249_v25, %s2303_s30  ;;  %vm858_vm5 = vcmp.eq.f32.partialorder %v2468_v6, 8.0  ;;  %v2254_v33 = vpack.i.bf16 %v787_v41, %v788_v24  ;;  %v834_v44 = vsel %vm826_vm13, %v2387_v21, 0.0  ;;  %v835_v46 = vsel %vm827_vm9, %v2390_v22, 0.0 }
 0x114   : > { %v849_v17 = vsel %vm2653_vm8, %v834_v44, %v2825_v16  ;;  %v850_v23 = vsel %vm2653_vm8, %v835_v46, %v2829_v53  ;;  %v866_v47 = vsel %vm858_vm5, %v2390_v22, 0.0  ;;  %vm2304_vm4 = vmmov 0  }
 0x115   : > { %2245 = vrot.lane.b32.xlu0 %v2244_v26, %s2300_s27  ;;  %1994 = vmatprep.mubr.msk.f32.mxu0 %vm2304_vm4, %v2295_v10  ;;  %v881_v6 = vsel %vm2681_vm6, %v866_v47, %v2829_v53  ;;  %v2264_v51 = vpack.i.bf16 %v849_v17, %v850_v23  ;;  %vm857_vm8 = vcmp.eq.f32.partialorder %v2455_v13, 8.0  ;;  %vm669_vm14 = vcmask 1042432  }
 0x116   : > { %2013 = vmatprep.mubr.msk.f32.mxu1 %vm2304_vm4, %v2295_v10  ;;  %v865_v22 = vsel %vm857_vm8, %v2387_v21, 0.0  ;;  %v2945_v52 = vsel %vm669_vm14, %v2362_v27, 0.0  ;;  %vm1121_vm11 = vcmask 261120   ;;  %vm1130_vm3 = vcmask 392192  }
 0x117   : > { %2260 = vrot.lane.b32.xlu1 %v2259_v55, %s2301_s28  ;;  %v880_v3 = vsel %vm2681_vm6, %v865_v22, %v2825_v16  ;;  %vm1112_vm6 = vcmask 130048   ;;  %vm1139_vm2 = vcmask 523264   ;;  %vm1148_vm12 = vcmask 654336  }
 0x118   : > { %vm1157_vm7 = vcmask 785408   ;;  %vm1166_vm15 = vcmask 916480   ;;  %vm1716_vm0 = vcmask 129024  }
 0x119   : > { %2255 = vrot.lane.b32.xlu0 %v2254_v33, %s2299_s26 }
 0x11b   : > { %1090 = vrot.lane.b32.xlu1 %v881_v6, %s2303_s30  ;;  %v245_v6 = vld [vmem:[%s227_s7] sm:$0x7f] }
 0x11d   : > { %2265 = vrot.lane.b32.xlu0 %v2264_v51, %s2302_s29 }
 0x11f   : > { %1719 = vrot.lane.b32.xlu1 %v2945_v52, %s2298_s25 }
 0x121   : > { %1088 = vrot.lane.b32.xlu0 %v880_v3, %s2303_s30 }
 0x123   : > { %1739 = vrot.lane.b32.xlu1 %v2945_v52, %s2300_s27 }
 0x125   : > { %1729 = vrot.lane.b32.xlu0 %v2945_v52, %s2297_s24 }
 0x127   : > { %1759 = vrot.lane.b32.xlu1 %v2945_v52, %s2301_s28 }
 0x129   : > { %1749 = vrot.lane.b32.xlu0 %v2945_v52, %s2299_s26 }
 0x12b   : > { %1779 = vrot.lane.b32.xlu1 %v2945_v52, %s2303_s30 }
 0x12d   : > { %1769 = vrot.lane.b32.xlu0 %v2945_v52, %s2302_s29 }
 0x158   : > { %v2141_v27 = vpop.permute.xlu1 %2140 }
 0x159   : > { %v2136_v21 = vpop.permute.xlu0 %2135  ;;  %v2143_v49 = vunpack.i.h.bf16 %v2141_v27  ;;  %v2142_v56 = vunpack.i.l.bf16 %v2141_v27 }
 0x15a   : > { %v2138_v38 = vunpack.i.h.bf16 %v2136_v21  ;;  %v2137_v54 = vunpack.i.l.bf16 %v2136_v21 }
 0x15c   : > { %v2151_v13 = vpop.permute.xlu1 %2150  ;;  %v1119_v29 = vsel %vm1112_vm6, %v2543_v62, %v2138_v38  ;;  %v1120_v57 = vsel %vm1112_vm6, %v2547_v1, %v2137_v54 }
 0x15d   : > { %v2153_v50 = vunpack.i.h.bf16 %v2151_v13  ;;  %v2152_v2 = vunpack.i.l.bf16 %v2151_v13  ;;  %v1128_v4 = vsel %vm1121_vm11, %v1119_v29, %v2143_v49  ;;  %v1129_v5 = vsel %vm1121_vm11, %v1120_v57, %v2142_v56 }
 0x15e   : > { %v1176_v56 = vsel %vm1139_vm2, %v245_v6, 0 }
 0x15f   : > { %v2146_v59 = vpop.permute.xlu0 %2145 }
 0x160   : > { %v2148_v58 = vunpack.i.h.bf16 %v2146_v59  ;;  %v2147_v61 = vunpack.i.l.bf16 %v2146_v59 }
 0x161   : > { %v2161_v39 = vpop.permute.xlu1 %2160 }
 0x162   : > { %v1137_v8 = vsel %vm1130_vm3, %v1128_v4, %v2148_v58  ;;  %v1138_v62 = vsel %vm1130_vm3, %v1129_v5, %v2147_v61  ;;  %v2163_v12 = vunpack.i.h.bf16 %v2161_v39  ;;  %v2162_v11 = vunpack.i.l.bf16 %v2161_v39 }
 0x163   : > { %v2965_v63 = vpop.permute.xlu0 %2155  ;;  %v1146_v34 = vsel %vm1139_vm2, %v1137_v8, %v2153_v50  ;;  %v1147_v0 = vsel %vm1139_vm2, %v1138_v62, %v2152_v2 }
 0x164   : > { %v1155_v37 = vsel %vm1148_vm12, %v1146_v34, %v2163_v12  ;;  %v1156_v32 = vsel %vm1148_vm12, %v1147_v0, %v2162_v11  ;;  %v2158_v23 = vunpack.i.h.bf16 %v2965_v63  ;;  %v2157_v47 = vunpack.i.l.bf16 %v2965_v63 }
 0x165   : > { %v2171_v7 = vpop.permute.xlu1 %2170 }
 0x166   : > { %v2173_v1 = vunpack.i.h.bf16 %v2171_v7  ;;  %v2172_v43 = vunpack.i.l.bf16 %v2171_v7  ;;  %v1117_v39 = vsel %vm1112_vm6, %v2591_v28, %v2158_v23  ;;  %v1118_v29 = vsel %vm1112_vm6, %v2611_v48, %v2157_v47 }
 0x167   : > { %v2166_v20 = vpop.permute.xlu0 %2165 }
 0x168   : > { %v1164_v60 = vsel %vm1157_vm7, %v1155_v37, %v2173_v1  ;;  %v1165_v40 = vsel %vm1157_vm7, %v1156_v32, %v2172_v43  ;;  %v2168_v51 = vunpack.i.h.bf16 %v2166_v20  ;;  %v2167_v22 = vunpack.i.l.bf16 %v2166_v20 }
 0x169   : > { %v2181_v14 = vpop.permute.xlu1 %2180 }
 0x16a   : > { %v2183_v15 = vunpack.i.h.bf16 %v2181_v14  ;;  %v2182_v42 = vunpack.i.l.bf16 %v2181_v14  ;;  %v1126_v61 = vsel %vm1121_vm11, %v1117_v39, %v2168_v51  ;;  %v1127_v63 = vsel %vm1121_vm11, %v1118_v29, %v2167_v22 }
 0x16b   : > { %v2176_v25 = vpop.permute.xlu0 %2175 }
 0x16c   : > { %v1173_v18 = vsel %vm1166_vm15, %v1164_v60, %v2183_v15  ;;  %v1174_v9 = vsel %vm1166_vm15, %v1165_v40, %v2182_v42  ;;  %v2178_v21 = vunpack.i.h.bf16 %v2176_v25  ;;  %v2177_v13 = vunpack.i.l.bf16 %v2176_v25 }
 0x16d   : > { %v2979_v45 = vand.u32 4294901760, %v1174_v9  ;;  %v2981_v36 = vand.u32 4294901760, %v1173_v18  ;;  %v2983_v26 = vpop.permute.xlu1 %2190  ;;  %v3032_v42 = vand.u32 4294901760, %v1176_v56 }
 0x16e   : > { %v1135_v5 = vsel %vm1130_vm3, %v1126_v61, %v2178_v21  ;;  %v1136_v7 = vsel %vm1130_vm3, %v1127_v63, %v2177_v13  ;;  %v2193_v28 = vunpack.i.h.bf16 %v2983_v26  ;;  %v2192_v48 = vunpack.i.l.bf16 %v2983_v26 }
 0x16f   : > { %v2987_v31 = vsub.f32 %v1173_v18, %v2981_v36  ;;  %v2186_v35 = vpop.permute.xlu0 %2185  ;;  %1979 = vmatpush3.msra.mxu0 %v2979_v45  ;;  %v2991_v41 = vsub.f32 %v1174_v9, %v2979_v45  ;;  %v3064_v29 = vsub.f32 %v1176_v56, %v3032_v42 }
 0x170   : > { %1980 = vmatprep.subr.mxu0 %v2295_v10  ;;  %v2188_v38 = vunpack.i.h.bf16 %v2186_v35  ;;  %v2187_v54 = vunpack.i.l.bf16 %v2186_v35  ;;  %v1115_v9 = vsel %vm1112_vm6, %v2702_v19, %v2193_v28  ;;  %v1116_v26 = vsel %vm1112_vm6, %v2706_v30, %v2192_v48 }
 0x171   : > { %v2994_v24 = vpop.permute.xlu1 %2200  ;;  %1981 = vmatpush3.msra.mxu0 %v2981_v36  ;;  %v1280_v55 = vand.u32 4294901760, %v2991_v41  ;;  %v1287_v33 = vand.u32 4294901760, %v2987_v31 }
 0x172   : > { %1982 = vmatprep.subr.mxu0 %v2295_v10  ;;  %v1144_v8 = vsel %vm1139_vm2, %v1135_v5, %v2188_v38  ;;  %v1145_v62 = vsel %vm1139_vm2, %v1136_v7, %v2187_v54  ;;  %v2203_v12 = vunpack.i.h.bf16 %v2994_v24  ;;  %v2202_v11 = vunpack.i.l.bf16 %v2994_v24 }
 0x173   : > { %v2196_v44 = vpop.permute.xlu0 %2195  ;;  %v1281_v46 = vsub.f32 %v2991_v41, %v1280_v55  ;;  %v1288_v17 = vsub.f32 %v2987_v31, %v1287_v33 }
 0x174   : > { %v2198_v57 = vunpack.i.h.bf16 %v2196_v44  ;;  %v2197_v58 = vunpack.i.l.bf16 %v2196_v44 }
 0x175   : > { %v2211_v3 = vpop.permute.xlu1 %2210  ;;  %v1282_v27 = vand.u32 4294901760, %v1281_v46  ;;  %v1289_v49 = vand.u32 4294901760, %v1288_v17  ;;  %v1124_v46 = vsel %vm1121_vm11, %v1115_v9, %v2203_v12  ;;  %v1125_v17 = vsel %vm1121_vm11, %v1116_v26, %v2202_v11 }
 0x176   : > { %v1153_v43 = vsel %vm1148_vm12, %v1144_v8, %v2198_v57  ;;  %v1154_v20 = vsel %vm1148_vm12, %v1145_v62, %v2197_v58  ;;  %v2213_v14 = vunpack.i.h.bf16 %v2211_v3  ;;  %v2212_v60 = vunpack.i.l.bf16 %v2211_v3 }
 0x177   : > { %v2206_v59 = vpop.permute.xlu0 %2205  ;;  %1998 = vmatpush3.msra.mxu1 %v1282_v27 }
 0x178   : > { %1999 = vmatprep.subr.mxu1 %v2295_v10  ;;  %v2208_v50 = vunpack.i.h.bf16 %v2206_v59  ;;  %v2207_v2 = vunpack.i.l.bf16 %v2206_v59  ;;  %v1133_v6 = vsel %vm1130_vm3, %v1124_v46, %v2213_v14  ;;  %v1134_v3 = vsel %vm1130_vm3, %v1125_v17, %v2212_v60 }
 0x179   : > { %v2221_v4 = vpop.permute.xlu1 %2220  ;;  %2000 = vmatpush3.msra.mxu1 %v1289_v49 }
 0x17a   : > { %2001 = vmatprep.subr.mxu1 %v2295_v10  ;;  %v1162_v37 = vsel %vm1157_vm7, %v1153_v43, %v2208_v50  ;;  %v1163_v32 = vsel %vm1157_vm7, %v1154_v20, %v2207_v2  ;;  %v2223_v40 = vunpack.i.h.bf16 %v2221_v4  ;;  %v2222_v23 = vunpack.i.l.bf16 %v2221_v4 }
 0x17b   : > { %v2216_v1 = vpop.permute.xlu0 %2215 }
 0x17c   : > { %v2218_v34 = vunpack.i.h.bf16 %v2216_v1  ;;  %v2217_v0 = vunpack.i.l.bf16 %v2216_v1  ;;  %v1142_v27 = vsel %vm1139_vm2, %v1133_v6, %v2223_v40  ;;  %v1143_v49 = vsel %vm1139_vm2, %v1134_v3, %v2222_v23 }
 0x17d   : > { %v2231_v15 = vpop.permute.xlu1 %2230 }
 0x17e   : > { %v1171_v25 = vsel %vm1166_vm15, %v1162_v37, %v2218_v34  ;;  %v1172_v18 = vsel %vm1166_vm15, %v1163_v32, %v2217_v0  ;;  %v2233_v47 = vunpack.i.h.bf16 %v2231_v15  ;;  %v2232_v30 = vunpack.i.l.bf16 %v2231_v15 }
 0x17f   : > { %v3040_v35 = vand.u32 4294901760, %v1172_v18  ;;  %v3042_v24 = vand.u32 4294901760, %v1171_v25  ;;  %v2226_v44 = vpop.permute.xlu0 %2225 }
 0x180   : > { %v1151_v39 = vsel %vm1148_vm12, %v1142_v27, %v2233_v47  ;;  %v1152_v57 = vsel %vm1148_vm12, %v1143_v49, %v2232_v30  ;;  %v2228_v58 = vunpack.i.h.bf16 %v2226_v44  ;;  %v2227_v2 = vunpack.i.l.bf16 %v2226_v44 }
 0x181   : > { %v3048_v51 = vsub.f32 %v1172_v18, %v3040_v35  ;;  %v3051_v19 = vsub.f32 %v1171_v25, %v3042_v24  ;;  %1983 = vmatpush3.msra.mxu0 %v3040_v35  ;;  %v2241_v22 = vpop.permute.xlu1 %2240  ;;  %v1253_v18 = vand.u32 4294901760, %v3064_v29 }
 0x182   : > { %1984 = vmatprep.subr.mxu0 %v2295_v10  ;;  %v2243_v21 = vunpack.i.h.bf16 %v2241_v22  ;;  %v2242_v13 = vunpack.i.l.bf16 %v2241_v22  ;;  %v1113_v20 = vsel %vm1112_vm6, %v2825_v16, %v2228_v58  ;;  %v1114_v37 = vsel %vm1112_vm6, %v2829_v53, %v2227_v2 }
 0x183   : > { %v2236_v38 = vpop.permute.xlu0 %2235  ;;  %1985 = vmatpush3.msra.mxu0 %v3042_v24  ;;  %v1294_v54 = vand.u32 4294901760, %v3048_v51  ;;  %v1301_v59 = vand.u32 4294901760, %v3051_v19 }
 0x184   : > { %1986 = vmatprep.subr.mxu0 %v2295_v10  ;;  %v2238_v4 = vunpack.i.h.bf16 %v2236_v38  ;;  %v1160_v28 = vsel %vm1157_vm7, %v1151_v39, %v2243_v21  ;;  %v1161_v56 = vsel %vm1157_vm7, %v1152_v57, %v2242_v13  ;;  %v2237_v48 = vunpack.i.l.bf16 %v2236_v38 }
 0x185   : > { %v2251_v61 = vpop.permute.xlu1 %2250  ;;  %v1295_v63 = vsub.f32 %v3048_v51, %v1294_v54  ;;  %v1302_v50 = vsub.f32 %v3051_v19, %v1301_v59  ;;  %v1254_v57 = vsub.f32 %v3064_v29, %v1253_v18 }
 0x186   : > { %v2253_v5 = vunpack.i.h.bf16 %v2251_v61  ;;  %v2252_v7 = vunpack.i.l.bf16 %v2251_v61  ;;  %v1122_v32 = vsel %vm1121_vm11, %v1113_v20, %v2238_v4  ;;  %v1123_v60 = vsel %vm1121_vm11, %v1114_v37, %v2237_v48 }
 0x187   : > { %v2246_v8 = vpop.permute.xlu0 %2245  ;;  %v1296_v62 = vand.u32 4294901760, %v1295_v63  ;;  %v1303_v14 = vand.u32 4294901760, %v1302_v50 }
 0x188   : > { %v1169_v12 = vsel %vm1166_vm15, %v1160_v28, %v2253_v5  ;;  %v1170_v11 = vsel %vm1166_vm15, %v1161_v56, %v2252_v7  ;;  %v2248_v1 = vunpack.i.h.bf16 %v2246_v8  ;;  %v2247_v43 = vunpack.i.l.bf16 %v2246_v8 }
 0x189   : > { %v3079_v34 = vand.u32 4294901760, %v1170_v11  ;;  %v3081_v0 = vand.u32 4294901760, %v1169_v12  ;;  %2002 = vmatpush3.msra.mxu1 %v1296_v62  ;;  %v2261_v15 = vpop.permute.xlu1 %2260  ;;  %v1255_v56 = vand.u32 4294901760, %v1254_v57 }
 0x18a   : > { %2003 = vmatprep.subr.mxu1 %v2295_v10  ;;  %v1131_v53 = vsel %vm1130_vm3, %v1122_v32, %v2248_v1  ;;  %v1132_v9 = vsel %vm1130_vm3, %v1123_v60, %v2247_v43  ;;  %v2263_v46 = vunpack.i.h.bf16 %v2261_v15  ;;  %v2262_v17 = vunpack.i.l.bf16 %v2261_v15 }
 0x18b   : > { %v3089_v40 = vsub.f32 %v1170_v11, %v3079_v34  ;;  %v3092_v16 = vsub.f32 %v1169_v12, %v3081_v0  ;;  %v2256_v25 = vpop.permute.xlu0 %2255  ;;  %2004 = vmatpush3.msra.mxu1 %v1303_v14  ;;  %1987 = vmatpush3.msra.mxu0 %v3079_v34 }
 0x18c   : > { %v2258_v26 = vunpack.i.h.bf16 %v2256_v25  ;;  %v2257_v44 = vunpack.i.l.bf16 %v2256_v25  ;;  %1988 = vmatprep.subr.mxu0 %v2295_v10  ;;  %2005 = vmatprep.subr.mxu1 %v2295_v10 }
 0x18d   : > { %1989 = vmatpush3.msra.mxu0 %v3081_v0  ;;  %v1308_v23 = vand.u32 4294901760, %v3089_v40  ;;  %v1315_v47 = vand.u32 4294901760, %v3092_v16  ;;  %v1091_v58 = vpop.permute.xlu1 %1090 }
 0x18e   : > { %v1140_v6 = vsel %vm1139_vm2, %v1131_v53, %v2258_v26  ;;  %v1141_v30 = vsel %vm1139_vm2, %v1132_v9, %v2257_v44  ;;  %1990 = vmatprep.subr.mxu0 %v2295_v10 }
 0x18f   : > { %v2266_v22 = vpop.permute.xlu0 %2265  ;;  %v1309_v3 = vsub.f32 %v3089_v40, %v1308_v23  ;;  %v1316_v27 = vsub.f32 %v3092_v16, %v1315_v47  ;;  %v1150_v38 = vsel %vm1148_vm12, %v1141_v30, %v2262_v17  ;;  %v1149_v49 = vsel %vm1148_vm12, %v1140_v6, %v2263_v46 }
 0x190   : > { %v2268_v21 = vunpack.i.h.bf16 %v2266_v22  ;;  %v2267_v13 = vunpack.i.l.bf16 %v2266_v22 }
 0x191   : > { %v1310_v39 = vand.u32 4294901760, %v1309_v3  ;;  %v1317_v4 = vand.u32 4294901760, %v1316_v27 }
 0x192   : > { %v1159_v61 = vsel %vm1157_vm7, %v1150_v38, %v2267_v13  ;;  %v1158_v63 = vsel %vm1157_vm7, %v1149_v49, %v2268_v21 }
 0x193   : > { %v1089_v50 = vpop.permute.xlu0 %1088  ;;  %2006 = vmatpush3.msra.mxu1 %v1310_v39  ;;  %v1168_v2 = vsel %vm1166_vm15, %v1159_v61, %v1091_v58 }
 0x194   : > { %v1167_v5 = vsel %vm1166_vm15, %v1158_v63, %v1089_v50  ;;  %v3121_v7 = vand.u32 4294901760, %v1168_v2  ;;  %2007 = vmatprep.subr.mxu1 %v2295_v10 }
 0x195   : > { %v3124_v28 = vand.u32 4294901760, %v1167_v5  ;;  %2008 = vmatpush3.msra.mxu1 %v1317_v4 }
 0x196   : > { %1991 = vmatpush3.msra.mxu0 %v3121_v7  ;;  %2009 = vmatprep.subr.mxu1 %v2295_v10  ;;  %v3129_v48 = vsub.f32 %v1168_v2, %v3121_v7 }
 0x197   : > { %v3132_v8 = vsub.f32 %v1167_v5, %v3124_v28  ;;  %1992 = vmatprep.subr.mxu0 %v2295_v10 }
 0x198   : > { %1993 = vmatpush3.msra.mxu0 %v3124_v28  ;;  %v1322_v62 = vand.u32 4294901760, %v3129_v48 }
 0x199   : > { %2016 = vmatprep.subr.mxu0 %v2295_v10  ;;  %1995 = vmatmul.mubr.f32.vlgmr.msra.gmra.mxu0 %v1255_v56  ;;  %v1329_v12 = vand.u32 4294901760, %v3132_v8 }
 0x19a   : > { %2017 = vmatpush3.msra.mxu0 %v2991_v41  ;;  %v1323_v11 = vsub.f32 %v3129_v48, %v1322_v62  ;;  %2032 = vmatprep.mubr.msk.f32.mxu0 %vm2304_vm4, %v2295_v10 }
 0x19b   : > { %2018 = vmatprep.subr.mxu0 %v2295_v10  ;;  %v1330_v1 = vsub.f32 %v3132_v8, %v1329_v12 }
 0x19c   : > { %2019 = vmatpush3.msra.mxu0 %v2987_v31  ;;  %v1324_v43 = vand.u32 4294901760, %v1323_v11 }
 0x19d   : > { %2020 = vmatprep.subr.mxu0 %v2295_v10  ;;  %v1331_v20 = vand.u32 4294901760, %v1330_v1 }
 0x19e   : > { %2010 = vmatpush3.msra.mxu1 %v1324_v43  ;;  %2021 = vmatpush3.msra.mxu0 %v3048_v51 }
 0x19f   : > { %2011 = vmatprep.subr.mxu1 %v2295_v10  ;;  %2022 = vmatprep.subr.mxu0 %v2295_v10 }
 0x1a0   : > { %2012 = vmatpush3.msra.mxu1 %v1331_v20  ;;  %2023 = vmatpush3.msra.mxu0 %v3051_v19 }
 0x1a1   : > { %2014 = vmatmul.mubr.f32.vlgmr.msra.gmra.mxu1 %v3032_v42  ;;  %2024 = vmatprep.subr.mxu0 %v2295_v10 }
 0x1a2   : > { %2035 = vmatprep.subr.mxu1 %v2295_v10  ;;  %2025 = vmatpush3.msra.mxu0 %v3089_v40 }
 0x1a3   : > { %2036 = vmatpush3.msra.mxu1 %v2979_v45  ;;  %2026 = vmatprep.subr.mxu0 %v2295_v10 }
 0x1a4   : > { %2037 = vmatprep.subr.mxu1 %v2295_v10  ;;  %2027 = vmatpush3.msra.mxu0 %v3092_v16 }
 0x1a5   : > { %2038 = vmatpush3.msra.mxu1 %v2981_v36  ;;  %2028 = vmatprep.subr.mxu0 %v2295_v10 }
 0x1a6   : > { %2039 = vmatprep.subr.mxu1 %v2295_v10  ;;  %2029 = vmatpush3.msra.mxu0 %v3129_v48 }
 0x1a7   : > { %2040 = vmatpush3.msra.mxu1 %v3040_v35  ;;  %2030 = vmatprep.subr.mxu0 %v2295_v10 }
 0x1a8   : > { %2041 = vmatprep.subr.mxu1 %v2295_v10  ;;  %2031 = vmatpush3.msra.mxu0 %v3132_v8 }
 0x1a9   : > { %2042 = vmatpush3.msra.mxu1 %v3042_v24  ;;  %2033 = vmatmul.mubr.f32.vlgmr.msra.gmra.mxu0 %v3064_v29  ;;  %v1720_v29 = vpop.permute.xlu1 %1719 }
 0x1aa   : > { %2043 = vmatprep.subr.mxu1 %v2295_v10  ;;  %2054 = vmatprep.subr.mxu0 %v2295_v10 }
 0x1ab   : > { %2044 = vmatpush3.msra.mxu1 %v3079_v34  ;;  %2055 = vmatpush3.msra.mxu0 %v1280_v55 }
 0x1ac   : > { %2045 = vmatprep.subr.mxu1 %v2295_v10  ;;  %2056 = vmatprep.subr.mxu0 %v2295_v10 }
 0x1ad   : > { %2046 = vmatpush3.msra.mxu1 %v3081_v0  ;;  %2057 = vmatpush3.msra.mxu0 %v1287_v33  ;;  %v1740_v37 = vpop.permute.xlu1 %1739 }
 0x1ae   : > { %2047 = vmatprep.subr.mxu1 %v2295_v10  ;;  %2058 = vmatprep.subr.mxu0 %v2295_v10 }
 0x1af   : > { %2048 = vmatpush3.msra.mxu1 %v3121_v7  ;;  %2059 = vmatpush3.msra.mxu0 %v1294_v54 }
 0x1b0   : > { %2049 = vmatprep.subr.mxu1 %v2295_v10  ;;  %2060 = vmatprep.subr.mxu0 %v2295_v10 }
 0x1b1   : > { %2050 = vmatpush3.msra.mxu1 %v3124_v28  ;;  %2051 = vmatprep.mubr.msk.f32.mxu1 %vm2304_vm4, %v2295_v10  ;;  %v1760_v25 = vpop.permute.xlu1 %1759 }
 0x1b2   : > { %2061 = vmatpush3.msra.mxu0 %v1301_v59  ;;  %2052 = vmatmul.mubr.f32.vlgmr.msra.gmra.mxu1 %v1253_v18 }
 0x1b3   : > { %2062 = vmatprep.subr.mxu0 %v2295_v10  ;;  %2073 = vmatprep.subr.mxu1 %v2295_v10 }
 0x1b4   : > { %2063 = vmatpush3.msra.mxu0 %v1308_v23  ;;  %2074 = vmatpush3.msra.mxu1 %v2979_v45 }
 0x1b5   : > { %2064 = vmatprep.subr.mxu0 %v2295_v10  ;;  %2075 = vmatprep.subr.mxu1 %v2295_v10  ;;  %v1780_v44 = vpop.permute.xlu1 %1779 }
 0x1b6   : > { %2065 = vmatpush3.msra.mxu0 %v1315_v47  ;;  %2076 = vmatpush3.msra.mxu1 %v2981_v36 }
 0x1b7   : > { %2066 = vmatprep.subr.mxu0 %v2295_v10  ;;  %2077 = vmatprep.subr.mxu1 %v2295_v10 }
 0x1b8   : > { %2067 = vmatpush3.msra.mxu0 %v1322_v62  ;;  %2078 = vmatpush3.msra.mxu1 %v3040_v35 }
 0x1b9   : > { %2068 = vmatprep.subr.mxu0 %v2295_v10  ;;  %2079 = vmatprep.subr.mxu1 %v2295_v10 }
 0x1ba   : > { %2069 = vmatpush3.msra.mxu0 %v1329_v12  ;;  %2070 = vmatprep.mubr.msk.f32.mxu0 %vm2304_vm4, %v2295_v10 }
 0x1bb   : > { %2080 = vmatpush3.msra.mxu1 %v3042_v24  ;;  %2071 = vmatmul.mubr.f32.vlgmr.msra.gmra.mxu0 %v3032_v42 }
 0x1bc   : > { %2081 = vmatprep.subr.mxu1 %v2295_v10  ;;  %2089 = vmatprep.mubr.msk.f32.mxu1 %vm2304_vm4, %v2295_v10 }
 0x1bd   : > { %2082 = vmatpush3.msra.mxu1 %v3079_v34  ;;  %v1730_v34 = vpop.permute.xlu0 %1729 }
 0x1be   : > { %2083 = vmatprep.subr.mxu1 %v2295_v10 }
 0x1bf   : > { %2084 = vmatpush3.msra.mxu1 %v3081_v0 }
 0x1c0   : > { %2085 = vmatprep.subr.mxu1 %v2295_v10 }
 0x1c1   : > { %2086 = vmatpush3.msra.mxu1 %v3121_v7  ;;  %v1750_v32 = vpop.permute.xlu0 %1749 }
 0x1c2   : > { %2087 = vmatprep.subr.mxu1 %v2295_v10 }
 0x1c3   : > { %2088 = vmatpush3.msra.mxu1 %v3124_v28 }
 0x1c4   : > { %2090 = vmatmul.mubr.f32.vlgmr.msra.gmra.mxu1 %v3032_v42 }
 0x1c5   : > { %v1770_v53 = vpop.permute.xlu0 %1769 }
 0x259   : > { %v1257_v45 = vpop.f32.mrf.mxu0 }
 0x25b   : > { %v1996_v36 = vpop.f32.mrf.mxu0 }
 0x261   : > { %v1368_v31 = vpop.f32.mrf.mxu1 }
 0x262   : > { %v1369_v19 = vadd.f32 %v1368_v31, %v1257_v45 }
 0x263   : > { %v2015_v41 = vpop.f32.mrf.mxu1 }
 0x269   : > { %v1456_v55 = vpop.f32.mrf.mxu0 }
 0x26a   : > { %v1457_v59 = vadd.f32 %v1456_v55, %v1369_v19 }
 0x26b   : > { %v2034_v33 = vpop.f32.mrf.mxu0 }
 0x272   : > { %v1537_v35 = vpop.f32.mrf.mxu1 }
 0x273   : > { %v1538_v10 = vadd.f32 %v1537_v35, %v1457_v59 }
 0x274   : > { %v2053_v24 = vpop.f32.mrf.mxu1 }
 0x27b   : > { %v1632_v51 = vpop.f32.mrf.mxu0 }
 0x27c   : > { %v1633_v0 = vadd.f32 %v1632_v51, %v1538_v10 }
 0x27d   : > { %v2072_v54 = vpop.f32.mrf.mxu0 }
 0x284   : > { %v1711_v14 = vpop.f32.mrf.mxu1 }
 0x285   : > { %v1712_v42 = vadd.f32 %v1711_v14, %v1633_v0 }
 0x286   : > { %v2091_v15 = vpop.f32.mrf.mxu1 }
 0x287   : > { %v1715_v60 = vsub.f32 %v1712_v42, %v2945_v52  ;;  %v1732_v40 = vsub.f32 %v1712_v42, %v1730_v34  ;;  %v1722_v16 = vsub.f32 %v1712_v42, %v1720_v29  ;;  %v1752_v18 = vsub.f32 %v1712_v42, %v1750_v32 }
 0x288   : > { %v1742_v9 = vsub.f32 %v1712_v42, %v1740_v37  ;;  %v1772_v52 = vsub.f32 %v1712_v42, %v1770_v53  ;;  %v1762_v26 = vsub.f32 %v1712_v42, %v1760_v25  ;;  %v1782_v46 = vsub.f32 %v1712_v42, %v1780_v44 }
 0x289   : > { %1734 = vrot.lane.b32.xlu1 %v1732_v40, %s2302_s29  ;;  %1717 = vst.msk [vmem:[%s3236_s10] sm:$0x7f] %vm1716_vm0, %v1715_v60  ;;  %1724 = vrot.lane.b32.xlu0 %v1722_v16, %s2303_s30 }
 0x28d   : > { %1754 = vrot.lane.b32.xlu1 %v1752_v18, %s2299_s26  ;;  %1744 = vrot.lane.b32.xlu0 %v1742_v9, %s2301_s28 }
 0x291   : > { %1774 = vrot.lane.b32.xlu1 %v1772_v52, %s2297_s24  ;;  %1764 = vrot.lane.b32.xlu0 %v1762_v26, %s2300_s27 }
 0x295   : > { %1784 = vrot.lane.b32.xlu0 %v1782_v46, %s2298_s25 }
 0x2fb   : > { %v1735_v17 = vpop.permute.xlu1 %1734  ;;  %v1725_v23 = vpop.permute.xlu0 %1724 }
 0x2fc   : > { %1914 = vst.msk [vmem:[%s3236_s10 + $0x10] sm:$0x7f] %vm1716_vm0, %v1735_v17  ;;  %1913 = vst.msk [vmem:[%s3236_s10 + $0x8] sm:$0x7f] %vm1716_vm0, %v1725_v23 }
 0x2ff   : > { %v1755_v47 = vpop.permute.xlu1 %1754  ;;  %v1745_v6 = vpop.permute.xlu0 %1744 }
 0x300   : > { %1916 = vst.msk [vmem:[%s3236_s10 + $0x20] sm:$0x7f] %vm1716_vm0, %v1755_v47  ;;  %1915 = vst.msk [vmem:[%s3236_s10 + $0x18] sm:$0x7f] %vm1716_vm0, %v1745_v6 }
 0x303   : > { %v1775_v30 = vpop.permute.xlu1 %1774  ;;  %v1765_v22 = vpop.permute.xlu0 %1764 }
 0x304   : > { %1918 = vst.msk [vmem:[%s3236_s10 + $0x30] sm:$0x7f] %vm1716_vm0, %v1775_v30  ;;  %1917 = vst.msk [vmem:[%s3236_s10 + $0x28] sm:$0x7f] %vm1716_vm0, %v1765_v22 }
 0x307   : > { %v1785_v3 = vpop.permute.xlu0 %1784 }
 0x308   : > { %1919 = vst.msk [vmem:[%s3236_s10 + $0x38] sm:$0x7f] %vm1716_vm0, %v1785_v3 }
 0x309 PF: > { %s13_s14 = sadd.s32 1, %s2291_s14   ;;  %s3292_s12 = smov %s2287_s13 }
 0x30a   : > { %p10_p5 = scmp.ge.s32.totalorder %s13_s14, 4   ;;  %s3293_s13 = smov %s3295_s15 }
 0x30c   :  { %12 = sbr.rel (!%p10_p5) target bundleno = 2 (0x2), region = 75 }

</bundles_post_ra>
